<compile_context>
chip_gen: v7x
topology: tpu7x:2x2x1
jax: 0.10.0
libtpu: 0.0.40
codegen_flags: <defaults>
</compile_context>

<pallas_src>
import functools

import jax
import jax.numpy as jnp
import numpy as np
from jax.experimental import pallas as pl
from jax.experimental.pallas import tpu as pltpu


def msffe_kernel(x_ref, wcat_ref, bcat_ref, se1t_ref, se2_ref, wf_ref, bf_ref,
                 scale_ref, shift_ref, mask_ref, out_ref, col_ref, acc_ref, *, wp):
    """One batch sample per grid step.

    x_ref    : (1, C, s_in) f32   zero-padded, spatially-flattened padded image
    wcat_ref : (5, 3C, 5C) bf16   conv1/conv3/conv5 weights, chunked by tap-row dy
    bcat_ref : (3C, 1) f32        concatenated conv biases
    se1t_ref : (3C, R) f32        SE fc1 weight, transposed (bias=False)
    se2_ref  : (3C, R) f32        SE fc2 weight, PyTorch layout (bias=False)
    wf_ref   : (C, 3C) bf16       1x1 fusion conv weight
    bf_ref, scale_ref, shift_ref : (C, 1) f32
    mask_ref : (1, Lp) f32        1/(H*W) at valid spatial columns, 0 elsewhere
    out_ref  : (1, C, Lp) f32     output in (C, flat-spatial) layout
    col_ref  : (2, 5C, Lp) bf16   double-buffered im2col chunk scratch
    acc_ref  : (3C, Lp) f32       fusion accumulator scratch
    """
    C = out_ref.shape[1]
    L = out_ref.shape[2]

    # --- conv1+conv3+conv5 as one K=25C matmul, done as 5 accumulating K=5C
    # chunks so the lane-shift im2col copies overlap the MXU work. ---
    for dy in range(5):
        slot = dy % 2
        for dx in range(5):
            off = dy * wp + dx
            col_ref[slot, dx * C:(dx + 1) * C, :] = (
                x_ref[0, :, off:off + L].astype(jnp.bfloat16))
        part = jnp.dot(wcat_ref[dy], col_ref[slot],
                       preferred_element_type=jnp.float32)
        if dy == 0:
            acc_ref[...] = part
        else:
            acc_ref[...] += part

    fusion = acc_ref[...] + bcat_ref[...]                       # (3C, Lp) f32

    # --- squeeze-excitation: masked mean (mask carries 1/(H*W)), two bias-free
    # FCs as VPU broadcast-multiply + reduce (no MXU round-trips). ---
    y = jnp.sum(fusion * mask_ref[...], axis=1, keepdims=True)          # (3C,1)
    h = jnp.maximum(jnp.sum(se1t_ref[...] * y, axis=0, keepdims=True),
                    0.0)                                                 # (1,R)
    s = jax.nn.sigmoid(jnp.sum(se2_ref[...] * h, axis=1, keepdims=True))  # (3C,1)

    # --- gate + 1x1 fusion conv + BN (inference form) + ReLU ---
    gated = (fusion * s).astype(jnp.bfloat16)                   # (3C, Lp) bf16
    out = jnp.dot(wf_ref[...], gated,
                  preferred_element_type=jnp.float32) + bf_ref[...]
    out_ref[0] = jnp.maximum(out * scale_ref[...] + shift_ref[...], 0.0)


def msffe_forward(x_nchw, params):
    """x_nchw: (N, C, H, W) float32.  Returns (N, C, H, W)."""
    (w1, b1, w3, b3, w5, b5, se1, se2, wf, bf, scale, shift) = params
    N, C, H, W = x_nchw.shape
    Hp, Wp = H + 4, W + 4                       # spatial pad 2 (covers 5x5 conv)
    L = H * Wp                                  # flat output length (incl. W-pad cols)
    Lp = ((L + 127) // 128) * 128               # lane-dense output length
    S = Hp * Wp
    s_in = max(S, 4 * Wp + 4 + Lp)              # max flat index touched + 1
    s_in = ((s_in + 127) // 128) * 128
    R = se1.shape[0]
    f32, bf16 = jnp.float32, jnp.bfloat16

    # Pad spatially by 2, flatten spatial, zero-pad the flat axis so every
    # tap-shifted window of length Lp stays in bounds.
    xp = jnp.pad(x_nchw, ((0, 0), (0, 0), (2, 2), (2, 2))).reshape(N, C, S)
    xflat = jnp.pad(xp, ((0, 0), (0, 0), (0, s_in - S))).astype(f32)

    # Concatenated conv weights chunked by tap-row dy:
    # wcat5[dy, b*C + co, dx*C + c] for branch b in {conv1, conv3, conv5}.
    block1 = jnp.zeros((25, C, C), f32).at[12].set(w1[:, :, 0, 0])   # 1x1 -> center tap
    block3 = jnp.zeros((25, C, C), f32)
    for dy in range(3):
        for dx in range(3):
            block3 = block3.at[(dy + 1) * 5 + (dx + 1)].set(w3[:, :, dy, dx])
    block5 = w5.transpose(2, 3, 0, 1).reshape(25, C, C)              # [t, co, c]
    full = jnp.stack([block1, block3, block5], axis=0)               # (3, 25, co, c)
    wcat5 = (full.reshape(3, 5, 5, C, C)                             # (b, dy, dx, co, c)
                 .transpose(1, 0, 3, 2, 4)                           # (dy, b, co, dx, c)
                 .reshape(5, 3 * C, 5 * C)
                 .astype(bf16))
    bcat = jnp.concatenate([b1, b3, b5]).reshape(3 * C, 1).astype(f32)

    # Valid-column mask, pre-scaled by 1/(H*W) so the kernel's sum is the mean.
    col_idx = jnp.arange(Lp)
    mask = jnp.where((col_idx < L) & (col_idx % Wp < W),
                     1.0 / (H * W), 0.0).astype(f32).reshape(1, Lp)

    se1t = se1.T.astype(f32)                    # (3C, R)
    se2f = se2.astype(f32)                      # (3C, R)
    wf_b = wf.astype(bf16)                      # (C, 3C)

    cost = pl.CostEstimate(
        flops=int(N * (2 * (3 * C) * (25 * C) * Lp + 2 * C * (3 * C) * Lp)),
        transcendentals=int(N * 3 * C),
        bytes_accessed=int(xflat.size * 4 + wcat5.size * 2 + wf_b.size * 2
                           + (bcat.size + se1t.size + se2f.size + 3 * C + Lp) * 4
                           + N * C * Lp * 4),
    )

    kernel = functools.partial(msffe_kernel, wp=Wp)
    out_flat = pl.pallas_call(
        kernel,
        out_shape=jax.ShapeDtypeStruct((N, C, Lp), f32),
        grid=(N,),
        in_specs=[
            pl.BlockSpec((1, C, s_in), lambda n: (n, 0, 0)),
            pl.BlockSpec((5, 3 * C, 5 * C), lambda n: (0, 0, 0)),
            pl.BlockSpec((3 * C, 1), lambda n: (0, 0)),
            pl.BlockSpec((3 * C, R), lambda n: (0, 0)),
            pl.BlockSpec((3 * C, R), lambda n: (0, 0)),
            pl.BlockSpec((C, 3 * C), lambda n: (0, 0)),
            pl.BlockSpec((C, 1), lambda n: (0, 0)),
            pl.BlockSpec((C, 1), lambda n: (0, 0)),
            pl.BlockSpec((C, 1), lambda n: (0, 0)),
            pl.BlockSpec((1, Lp), lambda n: (0, 0)),
        ],
        out_specs=pl.BlockSpec((1, C, Lp), lambda n: (n, 0, 0)),
        scratch_shapes=[pltpu.VMEM((2, 5 * C, Lp), bf16),
                        pltpu.VMEM((3 * C, Lp), f32)],
        compiler_params=pltpu.CompilerParams(dimension_semantics=("parallel",)),
        cost_estimate=cost,
    )(xflat, wcat5, bcat, se1t, se2f, wf_b,
      bf.reshape(C, 1), scale.reshape(C, 1), shift.reshape(C, 1), mask)

    # Drop flat padding + horizontal-pad garbage cols: (N,C,Lp) -> (N,C,H,W).
    return out_flat[:, :, :L].reshape(N, C, H, Wp)[:, :, :, :W]


def msffe_reference(x, params):
    """Pure-JAX f32 reference (lax.conv, NCHW) for correctness checking."""
    (w1, b1, w3, b3, w5, b5, se1, se2, wf, bf, scale, shift) = params
    dn = ('NCHW', 'OIHW', 'NCHW')

    def conv(xx, w, b, pad):
        y = jax.lax.conv_general_dilated(xx, w, (1, 1), [(pad, pad), (pad, pad)],
                                         dimension_numbers=dn)
        return y + b.reshape(1, -1, 1, 1)

    c1 = conv(x, w1, b1, 0)
    c3 = conv(x, w3, b3, 1)
    c5 = conv(x, w5, b5, 2)
    fusion = jnp.concatenate([c1, c3, c5], axis=1)                   # (N, 3C, H, W)
    y = jnp.mean(fusion, axis=(2, 3))                                # (N, 3C)
    h = jnp.maximum(y @ se1.T, 0.0)
    s = jax.nn.sigmoid(h @ se2.T)[:, :, None, None]
    fusion = fusion * s
    out = jnp.einsum('nchw,dc->ndhw', fusion, wf) + bf.reshape(1, -1, 1, 1)
    out = jnp.maximum(out * scale.reshape(1, -1, 1, 1)
                      + shift.reshape(1, -1, 1, 1), 0.0)
    return out


def make_params(C, key):
    """Deterministic synthetic parameters in PyTorch layouts (MSFFE(in_channels=C))."""
    R = (3 * C) // 16                       # SE reduction=16 on 3C channels
    ks = jax.random.split(key, 12)
    f32 = jnp.float32
    w1 = jax.random.normal(ks[0], (C, C, 1, 1), f32) * 0.1
    b1 = jax.random.normal(ks[1], (C,), f32) * 0.05
    w3 = jax.random.normal(ks[2], (C, C, 3, 3), f32) * 0.05
    b3 = jax.random.normal(ks[3], (C,), f32) * 0.05
    w5 = jax.random.normal(ks[4], (C, C, 5, 5), f32) * 0.03
    b5 = jax.random.normal(ks[5], (C,), f32) * 0.05
    se1 = jax.random.normal(ks[6], (R, 3 * C), f32) * 0.1   # fc1 (bias=False)
    se2 = jax.random.normal(ks[7], (3 * C, R), f32) * 0.1   # fc2 (bias=False)
    wf = jax.random.normal(ks[8], (C, 3 * C), f32) * 0.05
    bf = jax.random.normal(ks[9], (C,), f32) * 0.05
    # BatchNorm (inference): fold gamma/beta/running stats into scale/shift
    gamma = 1.0 + 0.1 * jax.random.normal(ks[10], (C,), f32)
    beta = 0.1 * jax.random.normal(ks[11], (C,), f32)
    run_mean = jnp.zeros((C,), f32)
    run_var = jnp.ones((C,), f32)
    eps = 1e-5
    scale = gamma / jnp.sqrt(run_var + eps)
    shift = beta - run_mean * scale
    return (w1, b1, w3, b3, w5, b5, se1, se2, wf, bf, scale, shift)


if __name__ == "__main__":
    # 3C = 48 -> SE hidden = 48 // 16 = 3 (C must be >= 6 for a non-degenerate SE).
    C, N, H, W = 16, 2, 16, 16
    key = jax.random.PRNGKey(0)
    kx, kp = jax.random.split(key)
    x = jax.random.normal(kx, (N, C, H, W), jnp.float32)   # NCHW like PyTorch
    params = make_params(C, kp)

    out = jax.block_until_ready(msffe_forward(x, params))
    ref = jax.block_until_ready(msffe_reference(x, params))
    # bf16 MXU operands (f32 accumulation) -> slightly relaxed tolerance.
    np.testing.assert_allclose(np.asarray(out), np.asarray(ref),
                               rtol=1e-2, atol=1e-2)
    print("KERNEL_OK")
</pallas_src>

<mosaic_0001>
module attributes {stable_mosaic.version = 11 : i64} {
  func.func @msffe_kernel(%arg0: i32, %arg1: memref<1x16x512xf32, #tpu.memory_space<vmem>>, %arg2: memref<5x48x80xbf16, #tpu.memory_space<vmem>>, %arg3: memref<48x1xf32, #tpu.memory_space<vmem>>, %arg4: memref<48x3xf32, #tpu.memory_space<vmem>>, %arg5: memref<48x3xf32, #tpu.memory_space<vmem>>, %arg6: memref<16x48xbf16, #tpu.memory_space<vmem>>, %arg7: memref<16x1xf32, #tpu.memory_space<vmem>>, %arg8: memref<16x1xf32, #tpu.memory_space<vmem>>, %arg9: memref<16x1xf32, #tpu.memory_space<vmem>>, %arg10: memref<1x384xf32, #tpu.memory_space<vmem>>, %arg11: memref<1x16x384xf32, #tpu.memory_space<vmem>>, %arg12: memref<2x80x384xbf16, #tpu.memory_space<vmem>>, %arg13: memref<48x384xf32, #tpu.memory_space<vmem>>) attributes {dimension_semantics = [#tpu.dimension_semantics<parallel>], iteration_bounds = array<i64: 2>, scalar_prefetch = 0 : i64, scratch_operands = 2 : i64, tpu.core_type = #tpu.core_type<tc>, window_params = [{transform_indices = @transform_0, window_bounds = array<i64: 1, 16, 512>}, {pipeline_mode = #tpu.pipeline_mode<synchronous>, transform_indices = @transform_1, window_bounds = array<i64: 5, 48, 80>}, {pipeline_mode = #tpu.pipeline_mode<synchronous>, transform_indices = @transform_2, window_bounds = array<i64: 48, 1>}, {pipeline_mode = #tpu.pipeline_mode<synchronous>, transform_indices = @transform_3, window_bounds = array<i64: 48, 3>}, {pipeline_mode = #tpu.pipeline_mode<synchronous>, transform_indices = @transform_4, window_bounds = array<i64: 48, 3>}, {pipeline_mode = #tpu.pipeline_mode<synchronous>, transform_indices = @transform_5, window_bounds = array<i64: 16, 48>}, {pipeline_mode = #tpu.pipeline_mode<synchronous>, transform_indices = @transform_6, window_bounds = array<i64: 16, 1>}, {pipeline_mode = #tpu.pipeline_mode<synchronous>, transform_indices = @transform_7, window_bounds = array<i64: 16, 1>}, {pipeline_mode = #tpu.pipeline_mode<synchronous>, transform_indices = @transform_8, window_bounds = array<i64: 16, 1>}, {pipeline_mode = #tpu.pipeline_mode<synchronous>, transform_indices = @transform_9, window_bounds = array<i64: 1, 384>}, {transform_indices = @transform_10, window_bounds = array<i64: 1, 16, 384>}]} {
    %c0 = arith.constant 0 : index
    %c0_0 = arith.constant 0 : index
    %c0_1 = arith.constant 0 : index
    %0 = vector.load %arg1[%c0, %c0_0, %c0_1] : memref<1x16x512xf32, #tpu.memory_space<vmem>>, vector<1x16x384xf32>
    %1 = vector.shape_cast %0 : vector<1x16x384xf32> to vector<16x384xf32>
    %2 = arith.truncf %1 : vector<16x384xf32> to vector<16x384xbf16>
    %c0_2 = arith.constant 0 : index
    %c0_3 = arith.constant 0 : index
    %c0_4 = arith.constant 0 : index
    %3 = vector.load %arg12[%c0_2, %c0_3, %c0_4] : memref<2x80x384xbf16, #tpu.memory_space<vmem>>, vector<1x16x384xbf16>
    %4 = vector.shape_cast %3 : vector<1x16x384xbf16> to vector<16x384xbf16>
    %5 = vector.shape_cast %2 : vector<16x384xbf16> to vector<1x16x384xbf16>
    tpu.vector_store %arg12[%c0_2, %c0_3, %c0_4], %5 {strides = array<i32>} : memref<2x80x384xbf16, #tpu.memory_space<vmem>>, vector<1x16x384xbf16>,
    %c0_5 = arith.constant 0 : index
    %c0_6 = arith.constant 0 : index
    %c1 = arith.constant 1 : index
    %6 = vector.load %arg1[%c0_5, %c0_6, %c1] : memref<1x16x512xf32, #tpu.memory_space<vmem>>, vector<1x16x384xf32>
    %7 = vector.shape_cast %6 : vector<1x16x384xf32> to vector<16x384xf32>
    %8 = arith.truncf %7 : vector<16x384xf32> to vector<16x384xbf16>
    %c0_7 = arith.constant 0 : index
    %c16 = arith.constant 16 : index
    %c0_8 = arith.constant 0 : index
    %9 = vector.load %arg12[%c0_7, %c16, %c0_8] : memref<2x80x384xbf16, #tpu.memory_space<vmem>>, vector<1x16x384xbf16>
    %10 = vector.shape_cast %9 : vector<1x16x384xbf16> to vector<16x384xbf16>
    %11 = vector.shape_cast %8 : vector<16x384xbf16> to vector<1x16x384xbf16>
    tpu.vector_store %arg12[%c0_7, %c16, %c0_8], %11 {strides = array<i32>} : memref<2x80x384xbf16, #tpu.memory_space<vmem>>, vector<1x16x384xbf16>,
    %c0_9 = arith.constant 0 : index
    %c0_10 = arith.constant 0 : index
    %c2 = arith.constant 2 : index
    %12 = vector.load %arg1[%c0_9, %c0_10, %c2] : memref<1x16x512xf32, #tpu.memory_space<vmem>>, vector<1x16x384xf32>
    %13 = vector.shape_cast %12 : vector<1x16x384xf32> to vector<16x384xf32>
    %14 = arith.truncf %13 : vector<16x384xf32> to vector<16x384xbf16>
    %c0_11 = arith.constant 0 : index
    %c32 = arith.constant 32 : index
    %c0_12 = arith.constant 0 : index
    %15 = vector.load %arg12[%c0_11, %c32, %c0_12] : memref<2x80x384xbf16, #tpu.memory_space<vmem>>, vector<1x16x384xbf16>
    %16 = vector.shape_cast %15 : vector<1x16x384xbf16> to vector<16x384xbf16>
    %17 = vector.shape_cast %14 : vector<16x384xbf16> to vector<1x16x384xbf16>
    tpu.vector_store %arg12[%c0_11, %c32, %c0_12], %17 {strides = array<i32>} : memref<2x80x384xbf16, #tpu.memory_space<vmem>>, vector<1x16x384xbf16>,
    %c0_13 = arith.constant 0 : index
    %c0_14 = arith.constant 0 : index
    %c3 = arith.constant 3 : index
    %18 = vector.load %arg1[%c0_13, %c0_14, %c3] : memref<1x16x512xf32, #tpu.memory_space<vmem>>, vector<1x16x384xf32>
    %19 = vector.shape_cast %18 : vector<1x16x384xf32> to vector<16x384xf32>
    %20 = arith.truncf %19 : vector<16x384xf32> to vector<16x384xbf16>
    %c0_15 = arith.constant 0 : index
    %c48 = arith.constant 48 : index
    %c0_16 = arith.constant 0 : index
    %21 = vector.load %arg12[%c0_15, %c48, %c0_16] : memref<2x80x384xbf16, #tpu.memory_space<vmem>>, vector<1x16x384xbf16>
    %22 = vector.shape_cast %21 : vector<1x16x384xbf16> to vector<16x384xbf16>
    %23 = vector.shape_cast %20 : vector<16x384xbf16> to vector<1x16x384xbf16>
    tpu.vector_store %arg12[%c0_15, %c48, %c0_16], %23 {strides = array<i32>} : memref<2x80x384xbf16, #tpu.memory_space<vmem>>, vector<1x16x384xbf16>,
    %c0_17 = arith.constant 0 : index
    %c0_18 = arith.constant 0 : index
    %c4 = arith.constant 4 : index
    %24 = vector.load %arg1[%c0_17, %c0_18, %c4] : memref<1x16x512xf32, #tpu.memory_space<vmem>>, vector<1x16x384xf32>
    %25 = vector.shape_cast %24 : vector<1x16x384xf32> to vector<16x384xf32>
    %26 = arith.truncf %25 : vector<16x384xf32> to vector<16x384xbf16>
    %c0_19 = arith.constant 0 : index
    %c64 = arith.constant 64 : index
    %c0_20 = arith.constant 0 : index
    %27 = vector.load %arg12[%c0_19, %c64, %c0_20] : memref<2x80x384xbf16, #tpu.memory_space<vmem>>, vector<1x16x384xbf16>
    %28 = vector.shape_cast %27 : vector<1x16x384xbf16> to vector<16x384xbf16>
    %29 = vector.shape_cast %26 : vector<16x384xbf16> to vector<1x16x384xbf16>
    tpu.vector_store %arg12[%c0_19, %c64, %c0_20], %29 {strides = array<i32>} : memref<2x80x384xbf16, #tpu.memory_space<vmem>>, vector<1x16x384xbf16>,
    %c0_21 = arith.constant 0 : index
    %c0_22 = arith.constant 0 : index
    %c0_23 = arith.constant 0 : index
    %30 = vector.load %arg2[%c0_21, %c0_22, %c0_23] : memref<5x48x80xbf16, #tpu.memory_space<vmem>>, vector<1x48x80xbf16>
    %31 = vector.shape_cast %30 : vector<1x48x80xbf16> to vector<48x80xbf16>
    %c0_24 = arith.constant 0 : index
    %c0_25 = arith.constant 0 : index
    %c0_26 = arith.constant 0 : index
    %32 = vector.load %arg12[%c0_24, %c0_25, %c0_26] : memref<2x80x384xbf16, #tpu.memory_space<vmem>>, vector<1x80x384xbf16>
    %33 = vector.shape_cast %32 : vector<1x80x384xbf16> to vector<80x384xbf16>
    %cst = arith.constant dense<0.000000e+00> : vector<48x384xf32>
    %34 = tpu.matmul %31, %33, %cst {dimension_numbers = #tpu.dot_dimension_numbers<[1], [0], [0], [1], [0, 0, 1, 1], [], []>} : vector<48x80xbf16>, vector<80x384xbf16>, vector<48x384xf32> -> vector<48x384xf32>
    %c0_27 = arith.constant 0 : index
    %c0_28 = arith.constant 0 : index
    %35 = vector.load %arg13[%c0_27, %c0_28] : memref<48x384xf32, #tpu.memory_space<vmem>>, vector<48x384xf32>
    tpu.vector_store %arg13[%c0_27, %c0_28], %34 {strides = array<i32>} : memref<48x384xf32, #tpu.memory_space<vmem>>, vector<48x384xf32>,
    %c0_29 = arith.constant 0 : index
    %c0_30 = arith.constant 0 : index
    %c20 = arith.constant 20 : index
    %36 = vector.load %arg1[%c0_29, %c0_30, %c20] : memref<1x16x512xf32, #tpu.memory_space<vmem>>, vector<1x16x384xf32>
    %37 = vector.shape_cast %36 : vector<1x16x384xf32> to vector<16x384xf32>
    %38 = arith.truncf %37 : vector<16x384xf32> to vector<16x384xbf16>
    %c1_31 = arith.constant 1 : index
    %c0_32 = arith.constant 0 : index
    %c0_33 = arith.constant 0 : index
    %39 = vector.load %arg12[%c1_31, %c0_32, %c0_33] : memref<2x80x384xbf16, #tpu.memory_space<vmem>>, vector<1x16x384xbf16>
    %40 = vector.shape_cast %39 : vector<1x16x384xbf16> to vector<16x384xbf16>
    %41 = vector.shape_cast %38 : vector<16x384xbf16> to vector<1x16x384xbf16>
    tpu.vector_store %arg12[%c1_31, %c0_32, %c0_33], %41 {strides = array<i32>} : memref<2x80x384xbf16, #tpu.memory_space<vmem>>, vector<1x16x384xbf16>,
    %c0_34 = arith.constant 0 : index
    %c0_35 = arith.constant 0 : index
    %c21 = arith.constant 21 : index
    %42 = vector.load %arg1[%c0_34, %c0_35, %c21] : memref<1x16x512xf32, #tpu.memory_space<vmem>>, vector<1x16x384xf32>
    %43 = vector.shape_cast %42 : vector<1x16x384xf32> to vector<16x384xf32>
    %44 = arith.truncf %43 : vector<16x384xf32> to vector<16x384xbf16>
    %c1_36 = arith.constant 1 : index
    %c16_37 = arith.constant 16 : index
    %c0_38 = arith.constant 0 : index
    %45 = vector.load %arg12[%c1_36, %c16_37, %c0_38] : memref<2x80x384xbf16, #tpu.memory_space<vmem>>, vector<1x16x384xbf16>
    %46 = vector.shape_cast %45 : vector<1x16x384xbf16> to vector<16x384xbf16>
    %47 = vector.shape_cast %44 : vector<16x384xbf16> to vector<1x16x384xbf16>
    tpu.vector_store %arg12[%c1_36, %c16_37, %c0_38], %47 {strides = array<i32>} : memref<2x80x384xbf16, #tpu.memory_space<vmem>>, vector<1x16x384xbf16>,
    %c0_39 = arith.constant 0 : index
    %c0_40 = arith.constant 0 : index
    %c22 = arith.constant 22 : index
    %48 = vector.load %arg1[%c0_39, %c0_40, %c22] : memref<1x16x512xf32, #tpu.memory_space<vmem>>, vector<1x16x384xf32>
    %49 = vector.shape_cast %48 : vector<1x16x384xf32> to vector<16x384xf32>
    %50 = arith.truncf %49 : vector<16x384xf32> to vector<16x384xbf16>
    %c1_41 = arith.constant 1 : index
    %c32_42 = arith.constant 32 : index
    %c0_43 = arith.constant 0 : index
    %51 = vector.load %arg12[%c1_41, %c32_42, %c0_43] : memref<2x80x384xbf16, #tpu.memory_space<vmem>>, vector<1x16x384xbf16>
    %52 = vector.shape_cast %51 : vector<1x16x384xbf16> to vector<16x384xbf16>
    %53 = vector.shape_cast %50 : vector<16x384xbf16> to vector<1x16x384xbf16>
    tpu.vector_store %arg12[%c1_41, %c32_42, %c0_43], %53 {strides = array<i32>} : memref<2x80x384xbf16, #tpu.memory_space<vmem>>, vector<1x16x384xbf16>,
    %c0_44 = arith.constant 0 : index
    %c0_45 = arith.constant 0 : index
    %c23 = arith.constant 23 : index
    %54 = vector.load %arg1[%c0_44, %c0_45, %c23] : memref<1x16x512xf32, #tpu.memory_space<vmem>>, vector<1x16x384xf32>
    %55 = vector.shape_cast %54 : vector<1x16x384xf32> to vector<16x384xf32>
    %56 = arith.truncf %55 : vector<16x384xf32> to vector<16x384xbf16>
    %c1_46 = arith.constant 1 : index
    %c48_47 = arith.constant 48 : index
    %c0_48 = arith.constant 0 : index
    %57 = vector.load %arg12[%c1_46, %c48_47, %c0_48] : memref<2x80x384xbf16, #tpu.memory_space<vmem>>, vector<1x16x384xbf16>
    %58 = vector.shape_cast %57 : vector<1x16x384xbf16> to vector<16x384xbf16>
    %59 = vector.shape_cast %56 : vector<16x384xbf16> to vector<1x16x384xbf16>
    tpu.vector_store %arg12[%c1_46, %c48_47, %c0_48], %59 {strides = array<i32>} : memref<2x80x384xbf16, #tpu.memory_space<vmem>>, vector<1x16x384xbf16>,
    %c0_49 = arith.constant 0 : index
    %c0_50 = arith.constant 0 : index
    %c24 = arith.constant 24 : index
    %60 = vector.load %arg1[%c0_49, %c0_50, %c24] : memref<1x16x512xf32, #tpu.memory_space<vmem>>, vector<1x16x384xf32>
    %61 = vector.shape_cast %60 : vector<1x16x384xf32> to vector<16x384xf32>
    %62 = arith.truncf %61 : vector<16x384xf32> to vector<16x384xbf16>
    %c1_51 = arith.constant 1 : index
    %c64_52 = arith.constant 64 : index
    %c0_53 = arith.constant 0 : index
    %63 = vector.load %arg12[%c1_51, %c64_52, %c0_53] : memref<2x80x384xbf16, #tpu.memory_space<vmem>>, vector<1x16x384xbf16>
    %64 = vector.shape_cast %63 : vector<1x16x384xbf16> to vector<16x384xbf16>
    %65 = vector.shape_cast %62 : vector<16x384xbf16> to vector<1x16x384xbf16>
    tpu.vector_store %arg12[%c1_51, %c64_52, %c0_53], %65 {strides = array<i32>} : memref<2x80x384xbf16, #tpu.memory_space<vmem>>, vector<1x16x384xbf16>,
    %c1_54 = arith.constant 1 : index
    %c0_55 = arith.constant 0 : index
    %c0_56 = arith.constant 0 : index
    %66 = vector.load %arg2[%c1_54, %c0_55, %c0_56] : memref<5x48x80xbf16, #tpu.memory_space<vmem>>, vector<1x48x80xbf16>
    %67 = vector.shape_cast %66 : vector<1x48x80xbf16> to vector<48x80xbf16>
    %c1_57 = arith.constant 1 : index
    %c0_58 = arith.constant 0 : index
    %c0_59 = arith.constant 0 : index
    %68 = vector.load %arg12[%c1_57, %c0_58, %c0_59] : memref<2x80x384xbf16, #tpu.memory_space<vmem>>, vector<1x80x384xbf16>
    %69 = vector.shape_cast %68 : vector<1x80x384xbf16> to vector<80x384xbf16>
    %cst_60 = arith.constant dense<0.000000e+00> : vector<48x384xf32>
    %70 = tpu.matmul %67, %69, %cst_60 {dimension_numbers = #tpu.dot_dimension_numbers<[1], [0], [0], [1], [0, 0, 1, 1], [], []>} : vector<48x80xbf16>, vector<80x384xbf16>, vector<48x384xf32> -> vector<48x384xf32>
    %c0_61 = arith.constant 0 : index
    %c0_62 = arith.constant 0 : index
    %71 = vector.load %arg13[%c0_61, %c0_62] : memref<48x384xf32, #tpu.memory_space<vmem>>, vector<48x384xf32>
    %72 = arith.addf %71, %70 : vector<48x384xf32>
    %c0_63 = arith.constant 0 : index
    %c0_64 = arith.constant 0 : index
    %73 = vector.load %arg13[%c0_63, %c0_64] : memref<48x384xf32, #tpu.memory_space<vmem>>, vector<48x384xf32>
    tpu.vector_store %arg13[%c0_63, %c0_64], %72 {strides = array<i32>} : memref<48x384xf32, #tpu.memory_space<vmem>>, vector<48x384xf32>,
    %c0_65 = arith.constant 0 : index
    %c0_66 = arith.constant 0 : index
    %c40 = arith.constant 40 : index
    %74 = vector.load %arg1[%c0_65, %c0_66, %c40] : memref<1x16x512xf32, #tpu.memory_space<vmem>>, vector<1x16x384xf32>
    %75 = vector.shape_cast %74 : vector<1x16x384xf32> to vector<16x384xf32>
    %76 = arith.truncf %75 : vector<16x384xf32> to vector<16x384xbf16>
    %c0_67 = arith.constant 0 : index
    %c0_68 = arith.constant 0 : index
    %c0_69 = arith.constant 0 : index
    %77 = vector.load %arg12[%c0_67, %c0_68, %c0_69] : memref<2x80x384xbf16, #tpu.memory_space<vmem>>, vector<1x16x384xbf16>
    %78 = vector.shape_cast %77 : vector<1x16x384xbf16> to vector<16x384xbf16>
    %79 = vector.shape_cast %76 : vector<16x384xbf16> to vector<1x16x384xbf16>
    tpu.vector_store %arg12[%c0_67, %c0_68, %c0_69], %79 {strides = array<i32>} : memref<2x80x384xbf16, #tpu.memory_space<vmem>>, vector<1x16x384xbf16>,
    %c0_70 = arith.constant 0 : index
    %c0_71 = arith.constant 0 : index
    %c41 = arith.constant 41 : index
    %80 = vector.load %arg1[%c0_70, %c0_71, %c41] : memref<1x16x512xf32, #tpu.memory_space<vmem>>, vector<1x16x384xf32>
    %81 = vector.shape_cast %80 : vector<1x16x384xf32> to vector<16x384xf32>
    %82 = arith.truncf %81 : vector<16x384xf32> to vector<16x384xbf16>
    %c0_72 = arith.constant 0 : index
    %c16_73 = arith.constant 16 : index
    %c0_74 = arith.constant 0 : index
    %83 = vector.load %arg12[%c0_72, %c16_73, %c0_74] : memref<2x80x384xbf16, #tpu.memory_space<vmem>>, vector<1x16x384xbf16>
    %84 = vector.shape_cast %83 : vector<1x16x384xbf16> to vector<16x384xbf16>
    %85 = vector.shape_cast %82 : vector<16x384xbf16> to vector<1x16x384xbf16>
    tpu.vector_store %arg12[%c0_72, %c16_73, %c0_74], %85 {strides = array<i32>} : memref<2x80x384xbf16, #tpu.memory_space<vmem>>, vector<1x16x384xbf16>,
    %c0_75 = arith.constant 0 : index
    %c0_76 = arith.constant 0 : index
    %c42 = arith.constant 42 : index
    %86 = vector.load %arg1[%c0_75, %c0_76, %c42] : memref<1x16x512xf32, #tpu.memory_space<vmem>>, vector<1x16x384xf32>
    %87 = vector.shape_cast %86 : vector<1x16x384xf32> to vector<16x384xf32>
    %88 = arith.truncf %87 : vector<16x384xf32> to vector<16x384xbf16>
    %c0_77 = arith.constant 0 : index
    %c32_78 = arith.constant 32 : index
    %c0_79 = arith.constant 0 : index
    %89 = vector.load %arg12[%c0_77, %c32_78, %c0_79] : memref<2x80x384xbf16, #tpu.memory_space<vmem>>, vector<1x16x384xbf16>
    %90 = vector.shape_cast %89 : vector<1x16x384xbf16> to vector<16x384xbf16>
    %91 = vector.shape_cast %88 : vector<16x384xbf16> to vector<1x16x384xbf16>
    tpu.vector_store %arg12[%c0_77, %c32_78, %c0_79], %91 {strides = array<i32>} : memref<2x80x384xbf16, #tpu.memory_space<vmem>>, vector<1x16x384xbf16>,
    %c0_80 = arith.constant 0 : index
    %c0_81 = arith.constant 0 : index
    %c43 = arith.constant 43 : index
    %92 = vector.load %arg1[%c0_80, %c0_81, %c43] : memref<1x16x512xf32, #tpu.memory_space<vmem>>, vector<1x16x384xf32>
    %93 = vector.shape_cast %92 : vector<1x16x384xf32> to vector<16x384xf32>
    %94 = arith.truncf %93 : vector<16x384xf32> to vector<16x384xbf16>
    %c0_82 = arith.constant 0 : index
    %c48_83 = arith.constant 48 : index
    %c0_84 = arith.constant 0 : index
    %95 = vector.load %arg12[%c0_82, %c48_83, %c0_84] : memref<2x80x384xbf16, #tpu.memory_space<vmem>>, vector<1x16x384xbf16>
    %96 = vector.shape_cast %95 : vector<1x16x384xbf16> to vector<16x384xbf16>
    %97 = vector.shape_cast %94 : vector<16x384xbf16> to vector<1x16x384xbf16>
    tpu.vector_store %arg12[%c0_82, %c48_83, %c0_84], %97 {strides = array<i32>} : memref<2x80x384xbf16, #tpu.memory_space<vmem>>, vector<1x16x384xbf16>,
    %c0_85 = arith.constant 0 : index
    %c0_86 = arith.constant 0 : index
    %c44 = arith.constant 44 : index
    %98 = vector.load %arg1[%c0_85, %c0_86, %c44] : memref<1x16x512xf32, #tpu.memory_space<vmem>>, vector<1x16x384xf32>
    %99 = vector.shape_cast %98 : vector<1x16x384xf32> to vector<16x384xf32>
    %100 = arith.truncf %99 : vector<16x384xf32> to vector<16x384xbf16>
    %c0_87 = arith.constant 0 : index
    %c64_88 = arith.constant 64 : index
    %c0_89 = arith.constant 0 : index
    %101 = vector.load %arg12[%c0_87, %c64_88, %c0_89] : memref<2x80x384xbf16, #tpu.memory_space<vmem>>, vector<1x16x384xbf16>
    %102 = vector.shape_cast %101 : vector<1x16x384xbf16> to vector<16x384xbf16>
    %103 = vector.shape_cast %100 : vector<16x384xbf16> to vector<1x16x384xbf16>
    tpu.vector_store %arg12[%c0_87, %c64_88, %c0_89], %103 {strides = array<i32>} : memref<2x80x384xbf16, #tpu.memory_space<vmem>>, vector<1x16x384xbf16>,
    %c2_90 = arith.constant 2 : index
    %c0_91 = arith.constant 0 : index
    %c0_92 = arith.constant 0 : index
    %104 = vector.load %arg2[%c2_90, %c0_91, %c0_92] : memref<5x48x80xbf16, #tpu.memory_space<vmem>>, vector<1x48x80xbf16>
    %105 = vector.shape_cast %104 : vector<1x48x80xbf16> to vector<48x80xbf16>
    %c0_93 = arith.constant 0 : index
    %c0_94 = arith.constant 0 : index
    %c0_95 = arith.constant 0 : index
    %106 = vector.load %arg12[%c0_93, %c0_94, %c0_95] : memref<2x80x384xbf16, #tpu.memory_space<vmem>>, vector<1x80x384xbf16>
    %107 = vector.shape_cast %106 : vector<1x80x384xbf16> to vector<80x384xbf16>
    %cst_96 = arith.constant dense<0.000000e+00> : vector<48x384xf32>
    %108 = tpu.matmul %105, %107, %cst_96 {dimension_numbers = #tpu.dot_dimension_numbers<[1], [0], [0], [1], [0, 0, 1, 1], [], []>} : vector<48x80xbf16>, vector<80x384xbf16>, vector<48x384xf32> -> vector<48x384xf32>
    %c0_97 = arith.constant 0 : index
    %c0_98 = arith.constant 0 : index
    %109 = vector.load %arg13[%c0_97, %c0_98] : memref<48x384xf32, #tpu.memory_space<vmem>>, vector<48x384xf32>
    %110 = arith.addf %109, %108 : vector<48x384xf32>
    %c0_99 = arith.constant 0 : index
    %c0_100 = arith.constant 0 : index
    %111 = vector.load %arg13[%c0_99, %c0_100] : memref<48x384xf32, #tpu.memory_space<vmem>>, vector<48x384xf32>
    tpu.vector_store %arg13[%c0_99, %c0_100], %110 {strides = array<i32>} : memref<48x384xf32, #tpu.memory_space<vmem>>, vector<48x384xf32>,
    %c0_101 = arith.constant 0 : index
    %c0_102 = arith.constant 0 : index
    %c60 = arith.constant 60 : index
    %112 = vector.load %arg1[%c0_101, %c0_102, %c60] : memref<1x16x512xf32, #tpu.memory_space<vmem>>, vector<1x16x384xf32>
    %113 = vector.shape_cast %112 : vector<1x16x384xf32> to vector<16x384xf32>
    %114 = arith.truncf %113 : vector<16x384xf32> to vector<16x384xbf16>
    %c1_103 = arith.constant 1 : index
    %c0_104 = arith.constant 0 : index
    %c0_105 = arith.constant 0 : index
    %115 = vector.load %arg12[%c1_103, %c0_104, %c0_105] : memref<2x80x384xbf16, #tpu.memory_space<vmem>>, vector<1x16x384xbf16>
    %116 = vector.shape_cast %115 : vector<1x16x384xbf16> to vector<16x384xbf16>
    %117 = vector.shape_cast %114 : vector<16x384xbf16> to vector<1x16x384xbf16>
    tpu.vector_store %arg12[%c1_103, %c0_104, %c0_105], %117 {strides = array<i32>} : memref<2x80x384xbf16, #tpu.memory_space<vmem>>, vector<1x16x384xbf16>,
    %c0_106 = arith.constant 0 : index
    %c0_107 = arith.constant 0 : index
    %c61 = arith.constant 61 : index
    %118 = vector.load %arg1[%c0_106, %c0_107, %c61] : memref<1x16x512xf32, #tpu.memory_space<vmem>>, vector<1x16x384xf32>
    %119 = vector.shape_cast %118 : vector<1x16x384xf32> to vector<16x384xf32>
    %120 = arith.truncf %119 : vector<16x384xf32> to vector<16x384xbf16>
    %c1_108 = arith.constant 1 : index
    %c16_109 = arith.constant 16 : index
    %c0_110 = arith.constant 0 : index
    %121 = vector.load %arg12[%c1_108, %c16_109, %c0_110] : memref<2x80x384xbf16, #tpu.memory_space<vmem>>, vector<1x16x384xbf16>
    %122 = vector.shape_cast %121 : vector<1x16x384xbf16> to vector<16x384xbf16>
    %123 = vector.shape_cast %120 : vector<16x384xbf16> to vector<1x16x384xbf16>
    tpu.vector_store %arg12[%c1_108, %c16_109, %c0_110], %123 {strides = array<i32>} : memref<2x80x384xbf16, #tpu.memory_space<vmem>>, vector<1x16x384xbf16>,
    %c0_111 = arith.constant 0 : index
    %c0_112 = arith.constant 0 : index
    %c62 = arith.constant 62 : index
    %124 = vector.load %arg1[%c0_111, %c0_112, %c62] : memref<1x16x512xf32, #tpu.memory_space<vmem>>, vector<1x16x384xf32>
    %125 = vector.shape_cast %124 : vector<1x16x384xf32> to vector<16x384xf32>
    %126 = arith.truncf %125 : vector<16x384xf32> to vector<16x384xbf16>
    %c1_113 = arith.constant 1 : index
    %c32_114 = arith.constant 32 : index
    %c0_115 = arith.constant 0 : index
    %127 = vector.load %arg12[%c1_113, %c32_114, %c0_115] : memref<2x80x384xbf16, #tpu.memory_space<vmem>>, vector<1x16x384xbf16>
    %128 = vector.shape_cast %127 : vector<1x16x384xbf16> to vector<16x384xbf16>
    %129 = vector.shape_cast %126 : vector<16x384xbf16> to vector<1x16x384xbf16>
    tpu.vector_store %arg12[%c1_113, %c32_114, %c0_115], %129 {strides = array<i32>} : memref<2x80x384xbf16, #tpu.memory_space<vmem>>, vector<1x16x384xbf16>,
    %c0_116 = arith.constant 0 : index
    %c0_117 = arith.constant 0 : index
    %c63 = arith.constant 63 : index
    %130 = vector.load %arg1[%c0_116, %c0_117, %c63] : memref<1x16x512xf32, #tpu.memory_space<vmem>>, vector<1x16x384xf32>
    %131 = vector.shape_cast %130 : vector<1x16x384xf32> to vector<16x384xf32>
    %132 = arith.truncf %131 : vector<16x384xf32> to vector<16x384xbf16>
    %c1_118 = arith.constant 1 : index
    %c48_119 = arith.constant 48 : index
    %c0_120 = arith.constant 0 : index
    %133 = vector.load %arg12[%c1_118, %c48_119, %c0_120] : memref<2x80x384xbf16, #tpu.memory_space<vmem>>, vector<1x16x384xbf16>
    %134 = vector.shape_cast %133 : vector<1x16x384xbf16> to vector<16x384xbf16>
    %135 = vector.shape_cast %132 : vector<16x384xbf16> to vector<1x16x384xbf16>
    tpu.vector_store %arg12[%c1_118, %c48_119, %c0_120], %135 {strides = array<i32>} : memref<2x80x384xbf16, #tpu.memory_space<vmem>>, vector<1x16x384xbf16>,
    %c0_121 = arith.constant 0 : index
    %c0_122 = arith.constant 0 : index
    %c64_123 = arith.constant 64 : index
    %136 = vector.load %arg1[%c0_121, %c0_122, %c64_123] : memref<1x16x512xf32, #tpu.memory_space<vmem>>, vector<1x16x384xf32>
    %137 = vector.shape_cast %136 : vector<1x16x384xf32> to vector<16x384xf32>
    %138 = arith.truncf %137 : vector<16x384xf32> to vector<16x384xbf16>
    %c1_124 = arith.constant 1 : index
    %c64_125 = arith.constant 64 : index
    %c0_126 = arith.constant 0 : index
    %139 = vector.load %arg12[%c1_124, %c64_125, %c0_126] : memref<2x80x384xbf16, #tpu.memory_space<vmem>>, vector<1x16x384xbf16>
    %140 = vector.shape_cast %139 : vector<1x16x384xbf16> to vector<16x384xbf16>
    %141 = vector.shape_cast %138 : vector<16x384xbf16> to vector<1x16x384xbf16>
    tpu.vector_store %arg12[%c1_124, %c64_125, %c0_126], %141 {strides = array<i32>} : memref<2x80x384xbf16, #tpu.memory_space<vmem>>, vector<1x16x384xbf16>,
    %c3_127 = arith.constant 3 : index
    %c0_128 = arith.constant 0 : index
    %c0_129 = arith.constant 0 : index
    %142 = vector.load %arg2[%c3_127, %c0_128, %c0_129] : memref<5x48x80xbf16, #tpu.memory_space<vmem>>, vector<1x48x80xbf16>
    %143 = vector.shape_cast %142 : vector<1x48x80xbf16> to vector<48x80xbf16>
    %c1_130 = arith.constant 1 : index
    %c0_131 = arith.constant 0 : index
    %c0_132 = arith.constant 0 : index
    %144 = vector.load %arg12[%c1_130, %c0_131, %c0_132] : memref<2x80x384xbf16, #tpu.memory_space<vmem>>, vector<1x80x384xbf16>
    %145 = vector.shape_cast %144 : vector<1x80x384xbf16> to vector<80x384xbf16>
    %cst_133 = arith.constant dense<0.000000e+00> : vector<48x384xf32>
    %146 = tpu.matmul %143, %145, %cst_133 {dimension_numbers = #tpu.dot_dimension_numbers<[1], [0], [0], [1], [0, 0, 1, 1], [], []>} : vector<48x80xbf16>, vector<80x384xbf16>, vector<48x384xf32> -> vector<48x384xf32>
    %c0_134 = arith.constant 0 : index
    %c0_135 = arith.constant 0 : index
    %147 = vector.load %arg13[%c0_134, %c0_135] : memref<48x384xf32, #tpu.memory_space<vmem>>, vector<48x384xf32>
    %148 = arith.addf %147, %146 : vector<48x384xf32>
    %c0_136 = arith.constant 0 : index
    %c0_137 = arith.constant 0 : index
    %149 = vector.load %arg13[%c0_136, %c0_137] : memref<48x384xf32, #tpu.memory_space<vmem>>, vector<48x384xf32>
    tpu.vector_store %arg13[%c0_136, %c0_137], %148 {strides = array<i32>} : memref<48x384xf32, #tpu.memory_space<vmem>>, vector<48x384xf32>,
    %c0_138 = arith.constant 0 : index
    %c0_139 = arith.constant 0 : index
    %c80 = arith.constant 80 : index
    %150 = vector.load %arg1[%c0_138, %c0_139, %c80] : memref<1x16x512xf32, #tpu.memory_space<vmem>>, vector<1x16x384xf32>
    %151 = vector.shape_cast %150 : vector<1x16x384xf32> to vector<16x384xf32>
    %152 = arith.truncf %151 : vector<16x384xf32> to vector<16x384xbf16>
    %c0_140 = arith.constant 0 : index
    %c0_141 = arith.constant 0 : index
    %c0_142 = arith.constant 0 : index
    %153 = vector.load %arg12[%c0_140, %c0_141, %c0_142] : memref<2x80x384xbf16, #tpu.memory_space<vmem>>, vector<1x16x384xbf16>
    %154 = vector.shape_cast %153 : vector<1x16x384xbf16> to vector<16x384xbf16>
    %155 = vector.shape_cast %152 : vector<16x384xbf16> to vector<1x16x384xbf16>
    tpu.vector_store %arg12[%c0_140, %c0_141, %c0_142], %155 {strides = array<i32>} : memref<2x80x384xbf16, #tpu.memory_space<vmem>>, vector<1x16x384xbf16>,
    %c0_143 = arith.constant 0 : index
    %c0_144 = arith.constant 0 : index
    %c81 = arith.constant 81 : index
    %156 = vector.load %arg1[%c0_143, %c0_144, %c81] : memref<1x16x512xf32, #tpu.memory_space<vmem>>, vector<1x16x384xf32>
    %157 = vector.shape_cast %156 : vector<1x16x384xf32> to vector<16x384xf32>
    %158 = arith.truncf %157 : vector<16x384xf32> to vector<16x384xbf16>
    %c0_145 = arith.constant 0 : index
    %c16_146 = arith.constant 16 : index
    %c0_147 = arith.constant 0 : index
    %159 = vector.load %arg12[%c0_145, %c16_146, %c0_147] : memref<2x80x384xbf16, #tpu.memory_space<vmem>>, vector<1x16x384xbf16>
    %160 = vector.shape_cast %159 : vector<1x16x384xbf16> to vector<16x384xbf16>
    %161 = vector.shape_cast %158 : vector<16x384xbf16> to vector<1x16x384xbf16>
    tpu.vector_store %arg12[%c0_145, %c16_146, %c0_147], %161 {strides = array<i32>} : memref<2x80x384xbf16, #tpu.memory_space<vmem>>, vector<1x16x384xbf16>,
    %c0_148 = arith.constant 0 : index
    %c0_149 = arith.constant 0 : index
    %c82 = arith.constant 82 : index
    %162 = vector.load %arg1[%c0_148, %c0_149, %c82] : memref<1x16x512xf32, #tpu.memory_space<vmem>>, vector<1x16x384xf32>
    %163 = vector.shape_cast %162 : vector<1x16x384xf32> to vector<16x384xf32>
    %164 = arith.truncf %163 : vector<16x384xf32> to vector<16x384xbf16>
    %c0_150 = arith.constant 0 : index
    %c32_151 = arith.constant 32 : index
    %c0_152 = arith.constant 0 : index
    %165 = vector.load %arg12[%c0_150, %c32_151, %c0_152] : memref<2x80x384xbf16, #tpu.memory_space<vmem>>, vector<1x16x384xbf16>
    %166 = vector.shape_cast %165 : vector<1x16x384xbf16> to vector<16x384xbf16>
    %167 = vector.shape_cast %164 : vector<16x384xbf16> to vector<1x16x384xbf16>
    tpu.vector_store %arg12[%c0_150, %c32_151, %c0_152], %167 {strides = array<i32>} : memref<2x80x384xbf16, #tpu.memory_space<vmem>>, vector<1x16x384xbf16>,
    %c0_153 = arith.constant 0 : index
    %c0_154 = arith.constant 0 : index
    %c83 = arith.constant 83 : index
    %168 = vector.load %arg1[%c0_153, %c0_154, %c83] : memref<1x16x512xf32, #tpu.memory_space<vmem>>, vector<1x16x384xf32>
    %169 = vector.shape_cast %168 : vector<1x16x384xf32> to vector<16x384xf32>
    %170 = arith.truncf %169 : vector<16x384xf32> to vector<16x384xbf16>
    %c0_155 = arith.constant 0 : index
    %c48_156 = arith.constant 48 : index
    %c0_157 = arith.constant 0 : index
    %171 = vector.load %arg12[%c0_155, %c48_156, %c0_157] : memref<2x80x384xbf16, #tpu.memory_space<vmem>>, vector<1x16x384xbf16>
    %172 = vector.shape_cast %171 : vector<1x16x384xbf16> to vector<16x384xbf16>
    %173 = vector.shape_cast %170 : vector<16x384xbf16> to vector<1x16x384xbf16>
    tpu.vector_store %arg12[%c0_155, %c48_156, %c0_157], %173 {strides = array<i32>} : memref<2x80x384xbf16, #tpu.memory_space<vmem>>, vector<1x16x384xbf16>,
    %c0_158 = arith.constant 0 : index
    %c0_159 = arith.constant 0 : index
    %c84 = arith.constant 84 : index
    %174 = vector.load %arg1[%c0_158, %c0_159, %c84] : memref<1x16x512xf32, #tpu.memory_space<vmem>>, vector<1x16x384xf32>
    %175 = vector.shape_cast %174 : vector<1x16x384xf32> to vector<16x384xf32>
    %176 = arith.truncf %175 : vector<16x384xf32> to vector<16x384xbf16>
    %c0_160 = arith.constant 0 : index
    %c64_161 = arith.constant 64 : index
    %c0_162 = arith.constant 0 : index
    %177 = vector.load %arg12[%c0_160, %c64_161, %c0_162] : memref<2x80x384xbf16, #tpu.memory_space<vmem>>, vector<1x16x384xbf16>
    %178 = vector.shape_cast %177 : vector<1x16x384xbf16> to vector<16x384xbf16>
    %179 = vector.shape_cast %176 : vector<16x384xbf16> to vector<1x16x384xbf16>
    tpu.vector_store %arg12[%c0_160, %c64_161, %c0_162], %179 {strides = array<i32>} : memref<2x80x384xbf16, #tpu.memory_space<vmem>>, vector<1x16x384xbf16>,
    %c4_163 = arith.constant 4 : index
    %c0_164 = arith.constant 0 : index
    %c0_165 = arith.constant 0 : index
    %180 = vector.load %arg2[%c4_163, %c0_164, %c0_165] : memref<5x48x80xbf16, #tpu.memory_space<vmem>>, vector<1x48x80xbf16>
    %181 = vector.shape_cast %180 : vector<1x48x80xbf16> to vector<48x80xbf16>
    %c0_166 = arith.constant 0 : index
    %c0_167 = arith.constant 0 : index
    %c0_168 = arith.constant 0 : index
    %182 = vector.load %arg12[%c0_166, %c0_167, %c0_168] : memref<2x80x384xbf16, #tpu.memory_space<vmem>>, vector<1x80x384xbf16>
    %183 = vector.shape_cast %182 : vector<1x80x384xbf16> to vector<80x384xbf16>
    %cst_169 = arith.constant dense<0.000000e+00> : vector<48x384xf32>
    %184 = tpu.matmul %181, %183, %cst_169 {dimension_numbers = #tpu.dot_dimension_numbers<[1], [0], [0], [1], [0, 0, 1, 1], [], []>} : vector<48x80xbf16>, vector<80x384xbf16>, vector<48x384xf32> -> vector<48x384xf32>
    %c0_170 = arith.constant 0 : index
    %c0_171 = arith.constant 0 : index
    %185 = vector.load %arg13[%c0_170, %c0_171] : memref<48x384xf32, #tpu.memory_space<vmem>>, vector<48x384xf32>
    %186 = arith.addf %185, %184 : vector<48x384xf32>
    %c0_172 = arith.constant 0 : index
    %c0_173 = arith.constant 0 : index
    %187 = vector.load %arg13[%c0_172, %c0_173] : memref<48x384xf32, #tpu.memory_space<vmem>>, vector<48x384xf32>
    tpu.vector_store %arg13[%c0_172, %c0_173], %186 {strides = array<i32>} : memref<48x384xf32, #tpu.memory_space<vmem>>, vector<48x384xf32>,
    %c0_174 = arith.constant 0 : index
    %c0_175 = arith.constant 0 : index
    %188 = vector.load %arg13[%c0_174, %c0_175] : memref<48x384xf32, #tpu.memory_space<vmem>>, vector<48x384xf32>
    %c0_176 = arith.constant 0 : index
    %c0_177 = arith.constant 0 : index
    %189 = vector.load %arg3[%c0_176, %c0_177] : memref<48x1xf32, #tpu.memory_space<vmem>>, vector<48x1xf32>
    %190 = vector.broadcast %189 : vector<48x1xf32> to vector<48x384xf32>
    %191 = arith.addf %188, %190 : vector<48x384xf32>
    %c0_178 = arith.constant 0 : index
    %c0_179 = arith.constant 0 : index
    %192 = vector.load %arg10[%c0_178, %c0_179] : memref<1x384xf32, #tpu.memory_space<vmem>>, vector<1x384xf32>
    %193 = vector.broadcast %192 : vector<1x384xf32> to vector<48x384xf32>
    %194 = arith.mulf %191, %193 : vector<48x384xf32>
    %cst_180 = arith.constant dense<0.000000e+00> : vector<48xf32>
    %195 = vector.multi_reduction <add>, %194, %cst_180 [1] : vector<48x384xf32> to vector<48xf32>
    %196 = vector.shape_cast %195 : vector<48xf32> to vector<48x1xf32>
    %c0_181 = arith.constant 0 : index
    %c0_182 = arith.constant 0 : index
    %197 = vector.load %arg4[%c0_181, %c0_182] : memref<48x3xf32, #tpu.memory_space<vmem>>, vector<48x3xf32>
    %198 = vector.broadcast %196 : vector<48x1xf32> to vector<48x3xf32>
    %199 = arith.mulf %197, %198 : vector<48x3xf32>
    %cst_183 = arith.constant dense<0.000000e+00> : vector<3xf32>
    %200 = vector.multi_reduction <add>, %199, %cst_183 [0] : vector<48x3xf32> to vector<3xf32>
    %201 = vector.shape_cast %200 : vector<3xf32> to vector<1x3xf32>
    %cst_184 = arith.constant 0.000000e+00 : f32
    %202 = vector.broadcast %cst_184 : f32 to vector<1x3xf32>
    %203 = arith.maximumf %201, %202 : vector<1x3xf32>
    %c0_185 = arith.constant 0 : index
    %c0_186 = arith.constant 0 : index
    %204 = vector.load %arg5[%c0_185, %c0_186] : memref<48x3xf32, #tpu.memory_space<vmem>>, vector<48x3xf32>
    %205 = vector.broadcast %203 : vector<1x3xf32> to vector<48x3xf32>
    %206 = arith.mulf %204, %205 : vector<48x3xf32>
    %cst_187 = arith.constant dense<0.000000e+00> : vector<48xf32>
    %207 = vector.multi_reduction <add>, %206, %cst_187 [1] : vector<48x3xf32> to vector<48xf32>
    %208 = vector.shape_cast %207 : vector<48xf32> to vector<48x1xf32>
    %209 = arith.negf %208 : vector<48x1xf32>
    %210 = math.exp %209 : vector<48x1xf32>
    %cst_188 = arith.constant 1.000000e+00 : f32
    %211 = vector.broadcast %cst_188 : f32 to vector<48x1xf32>
    %212 = arith.addf %211, %210 : vector<48x1xf32>
    %213 = arith.divf %211, %212 : vector<48x1xf32>
    %214 = vector.broadcast %213 : vector<48x1xf32> to vector<48x384xf32>
    %215 = arith.mulf %191, %214 : vector<48x384xf32>
    %216 = arith.truncf %215 : vector<48x384xf32> to vector<48x384xbf16>
    %c0_189 = arith.constant 0 : index
    %c0_190 = arith.constant 0 : index
    %217 = vector.load %arg6[%c0_189, %c0_190] : memref<16x48xbf16, #tpu.memory_space<vmem>>, vector<16x48xbf16>
    %cst_191 = arith.constant dense<0.000000e+00> : vector<16x384xf32>
    %218 = tpu.matmul %217, %216, %cst_191 {dimension_numbers = #tpu.dot_dimension_numbers<[1], [0], [0], [1], [0, 0, 1, 1], [], []>} : vector<16x48xbf16>, vector<48x384xbf16>, vector<16x384xf32> -> vector<16x384xf32>
    %c0_192 = arith.constant 0 : index
    %c0_193 = arith.constant 0 : index
    %219 = vector.load %arg7[%c0_192, %c0_193] : memref<16x1xf32, #tpu.memory_space<vmem>>, vector<16x1xf32>
    %220 = vector.broadcast %219 : vector<16x1xf32> to vector<16x384xf32>
    %221 = arith.addf %218, %220 : vector<16x384xf32>
    %c0_194 = arith.constant 0 : index
    %c0_195 = arith.constant 0 : index
    %222 = vector.load %arg8[%c0_194, %c0_195] : memref<16x1xf32, #tpu.memory_space<vmem>>, vector<16x1xf32>
    %223 = vector.broadcast %222 : vector<16x1xf32> to vector<16x384xf32>
    %224 = arith.mulf %221, %223 : vector<16x384xf32>
    %c0_196 = arith.constant 0 : index
    %c0_197 = arith.constant 0 : index
    %225 = vector.load %arg9[%c0_196, %c0_197] : memref<16x1xf32, #tpu.memory_space<vmem>>, vector<16x1xf32>
    %226 = vector.broadcast %225 : vector<16x1xf32> to vector<16x384xf32>
    %227 = arith.addf %224, %226 : vector<16x384xf32>
    %cst_198 = arith.constant 0.000000e+00 : f32
    %228 = vector.broadcast %cst_198 : f32 to vector<16x384xf32>
    %229 = arith.maximumf %227, %228 : vector<16x384xf32>
    %c0_199 = arith.constant 0 : index
    %c0_200 = arith.constant 0 : index
    %c0_201 = arith.constant 0 : index
    %230 = vector.load %arg11[%c0_199, %c0_200, %c0_201] : memref<1x16x384xf32, #tpu.memory_space<vmem>>, vector<1x16x384xf32>
    %231 = vector.shape_cast %230 : vector<1x16x384xf32> to vector<16x384xf32>
    %232 = vector.shape_cast %229 : vector<16x384xf32> to vector<1x16x384xf32>
    tpu.vector_store %arg11[%c0_199, %c0_200, %c0_201], %232 {strides = array<i32>} : memref<1x16x384xf32, #tpu.memory_space<vmem>>, vector<1x16x384xf32>,
    return
  }
  func.func @transform_0(%arg0: i32) -> (i32, i32, i32) {
    %c0_i32 = arith.constant 0 : i32
    %c0_i32_0 = arith.constant 0 : i32
    %c0_i32_1 = arith.constant 0 : i32
    return %arg0, %c0_i32, %c0_i32_0 : i32, i32, i32
  }
  func.func @transform_1(%arg0: i32) -> (i32, i32, i32) {
    %c0_i32 = arith.constant 0 : i32
    %c0_i32_0 = arith.constant 0 : i32
    %c0_i32_1 = arith.constant 0 : i32
    %c0_i32_2 = arith.constant 0 : i32
    return %c0_i32, %c0_i32_0, %c0_i32_1 : i32, i32, i32
  }
  func.func @transform_2(%arg0: i32) -> (i32, i32) {
    %c0_i32 = arith.constant 0 : i32
    %c0_i32_0 = arith.constant 0 : i32
    %c0_i32_1 = arith.constant 0 : i32
    return %c0_i32, %c0_i32_0 : i32, i32
  }
  func.func @transform_3(%arg0: i32) -> (i32, i32) {
    %c0_i32 = arith.constant 0 : i32
    %c0_i32_0 = arith.constant 0 : i32
    %c0_i32_1 = arith.constant 0 : i32
    return %c0_i32, %c0_i32_0 : i32, i32
  }
  func.func @transform_4(%arg0: i32) -> (i32, i32) {
    %c0_i32 = arith.constant 0 : i32
    %c0_i32_0 = arith.constant 0 : i32
    %c0_i32_1 = arith.constant 0 : i32
    return %c0_i32, %c0_i32_0 : i32, i32
  }
  func.func @transform_5(%arg0: i32) -> (i32, i32) {
    %c0_i32 = arith.constant 0 : i32
    %c0_i32_0 = arith.constant 0 : i32
    %c0_i32_1 = arith.constant 0 : i32
    return %c0_i32, %c0_i32_0 : i32, i32
  }
  func.func @transform_6(%arg0: i32) -> (i32, i32) {
    %c0_i32 = arith.constant 0 : i32
    %c0_i32_0 = arith.constant 0 : i32
    %c0_i32_1 = arith.constant 0 : i32
    return %c0_i32, %c0_i32_0 : i32, i32
  }
  func.func @transform_7(%arg0: i32) -> (i32, i32) {
    %c0_i32 = arith.constant 0 : i32
    %c0_i32_0 = arith.constant 0 : i32
    %c0_i32_1 = arith.constant 0 : i32
    return %c0_i32, %c0_i32_0 : i32, i32
  }
  func.func @transform_8(%arg0: i32) -> (i32, i32) {
    %c0_i32 = arith.constant 0 : i32
    %c0_i32_0 = arith.constant 0 : i32
    %c0_i32_1 = arith.constant 0 : i32
    return %c0_i32, %c0_i32_0 : i32, i32
  }
  func.func @transform_9(%arg0: i32) -> (i32, i32) {
    %c0_i32 = arith.constant 0 : i32
    %c0_i32_0 = arith.constant 0 : i32
    %c0_i32_1 = arith.constant 0 : i32
    return %c0_i32, %c0_i32_0 : i32, i32
  }
  func.func @transform_10(%arg0: i32) -> (i32, i32, i32) {
    %c0_i32 = arith.constant 0 : i32
    %c0_i32_0 = arith.constant 0 : i32
    %c0_i32_1 = arith.constant 0 : i32
    return %arg0, %c0_i32, %c0_i32_0 : i32, i32, i32
  }
}

</mosaic_0001>

<bundles_post_ra>
// kernel: tpu_custom_call.1
= control target key start
LH: loop header
LB: loop body
LE: loop exit
PB: predicated region body
PF: predicated region fallthrough
CT: control target
= control target key end

     0   :  { %15 = vsyncpa [#allocation5], 0  ;;  %s3935_s0 = inlined_call_operand.vmem [shape: f32[2,16,512], index: 0, kind: input, shape index: {}]   ;;  %s3936_s1 = inlined_call_operand.hbm [shape: bf16[5,48,80], index: 1, kind: input, shape index: {}]   ;;  %s3937_s2 = inlined_call_operand.vmem [shape: f32[48,1], index: 2, kind: input, shape index: {}]   ;;  %s3938_s3 = inlined_call_operand.vmem [shape: f32[48,3], index: 3, kind: input, shape index: {}]   ;;  %s3939_s4 = inlined_call_operand.vmem [shape: f32[48,3], index: 4, kind: input, shape index: {}]   ;;  %s3940_s5 = inlined_call_operand.vmem [shape: bf16[16,48], index: 5, kind: input, shape index: {}]   ;;  %s3941_s6 = inlined_call_operand.vmem [shape: f32[16,1], index: 6, kind: input, shape index: {}]   ;;  %s3942_s7 = inlined_call_operand.vmem [shape: f32[16,1], index: 7, kind: input, shape index: {}]   ;;  %s3943_s8 = inlined_call_operand.vmem [shape: f32[16,1], index: 8, kind: input, shape index: {}]   ;;  %s3944_s9 = inlined_call_operand.vmem [shape: f32[1,384], index: 9, kind: input, shape index: {}]   ;;  %s3945_s10 = inlined_call_operand.hbm [shape: f32[2,16,384], index: 10, kind: output, shape index: {}]  }
   0x1   :  { %16 = vsyncpa [#allocation6], 0 }
   0x2   :  { %18 = vsyncpa [#allocation6 + $0x1], 0  ;;  %s3352_s13 = smov 0   ;;  %s3354_s14 = smov 0  }
   0x3   :  { %s3356_s15 = smov 0   ;;  %s3358_s16 = smov 0  }
   0x4 LB: > { %s3373_s17 = sadd.s32 4294967295, %s3262_s16   ;;  %s2765_s18 = sadd.s32 4294967294, %s3262_s16   ;;  %s3262_s16 = sphi %s3358_s16, %s3961_s16   ;;  %s3258_s15 = sphi %s3356_s15, %s3960_s15   ;;  %s3254_s14 = sphi %s3354_s14, %s3959_s14   ;;  %s3250_s13 = sphi %s3352_s13, %s3958_s13  }
   0x5   : > { %s3377_s19 = sadd.s32 1, %s3262_s16   ;;  %s246_s20 = sadd.s32 1, %s3258_s15 }
   0x6   : > { %s243_s21 = ssub.s32 %s3262_s16, %s3377_s19  ;;  %p256_p0 = scmp.ne.s32.totalorder %s3258_s15, %s3254_s14 }
   0x7   : > { %p244_p1 = scmp.eq.s32.totalorder %s243_s21, 0  ;;  %p257_p2 = scmp.eq.s32.totalorder %s3373_s17, 1 }
   0x8   : > { %p262_p3 = scmp.ne.s32.totalorder %s3254_s14, %s3250_s13  ;;  %p263_p4 = scmp.eq.s32.totalorder %s2765_s18, 1 }
   0x9   : > { %s3388_s22 = scalar_select %p244_p1, %s3258_s15, %s246_s20  }
   0xa   : > { %p3390_p5 = por %p257_p2, %p256_p0  ;;  %p3394_p6 = por %p263_p4, %p262_p3 }
   0xb   : > { %p2766_p7 = scmp.ge.s32.totalorder %s3262_s16, 1  ;;  %p270_p8 = scmp.lt.s32.totalorder %s3262_s16, 3 }
   0xc   : > { %s3949_s23 = scalar_select %p3390_p5, 1, 0 }
   0xd   : > { %s3950_s24 = scalar_select %p3394_p6, 1, 0 }
   0xe   : > { %p3946_p9 = scmp.eq.s32.totalorder %s3373_s17, 0  ;;  %p3401_p10 = pnand %p2766_p7, %p270_p8 }
   0xf   : > { %s3264_s26 = smov [#allocation4]   ;;  %s3168_s11 = scalar_lea.hbm %s3936_s1, 1920 }
  0x10   : > { %s3951_s25 = scalar_select %p3401_p10, 1, 0 }
  0x11   : > { %s282_s27 = sshll.u32 %s3264_s26, 4  ;;  %p3051_p11 = pneg %p3401_p10  ;;  %s283_s27 = int_to_ptr.vmem [resolvable:$true] %s282_s27 }
  0x12   : > { %p3169_p13 = scmp.ne.s32.totalorder %s3936_s1, %s3168_s11  ;;  %p3175_p3 = scmp.lt.u32.totalorder %s3168_s11, %s3936_s1 }
  0x13   : > { %p3409_p12 = pnand %p3946_p9, %p3051_p11 }
  0x15   : > { %p3170_p0 = pneg %p3409_p12 }
  0x17   : > { %p3171_p1 = pnand %p3170_p0, %p3169_p13 }
  0x19   : > { %p3172_p2 = pneg %p3171_p1 }
  0x1b   : > { %p3177_p4 = pnand %p3175_p3, %p3172_p2 }
  0x1d   : > { %3180 = shalt.err (!%p3177_p4)
}
  0x1e   : > { %s3181_s26 = scalar_lea.vmem %s283_s27, 1920  ;;  %p3189_p9 = scmp.lt.s32.totalorder %s283_s27, %s283_s27 }
  0x1f   : > { %p3182_p7 = scmp.ne.s32.totalorder %s283_s27, %s3181_s26  ;;  %p3190_p6 = scmp.lt.s32.totalorder %s3181_s26, %s3181_s26 }
  0x21   : > { %p3184_p8 = pnand %p3182_p7, %p3170_p0  ;;  %p3191_p5 = por %p3190_p6, %p3189_p9 }
  0x23   : > { %p3185_p11 = pneg %p3184_p8 }
  0x25   : > { %p3192_p10 = pnand %p3191_p5, %p3185_p11 }
  0x27   : > { %3195 = shalt.err (!%p3192_p10)
}
  0x28   : > { %s3265_s29 = smov 64   ;;  %s3266_s30 = smov 4  }
  0x29   : > { %3054 = dma.hbm_to_vmem [thread:$0]  (!%p3409_p12), %s3936_s1, 1920, %s283_s27, [#allocation5], %s3265_s29, %s3265_s29, %s3266_s30  }
  0x2a   : > { %p3953_p13 = scmp.ne.s32.totalorder %s3951_s25, 0 }
  0x2b   : > { %p3954_p1 = scmp.eq.s32.totalorder (!%p3953_p13), %s3373_s17, 0 }
  0x2c   : > { %330 = sbr.rel (%p3953_p13) target bundleno = 1195 (0x4ab), region = 60 }
  0x33   : > { %3241 = dma.done.wait (%p3954_p1), [#allocation5], 1920   ;;  %p3955_p0 = pmov %p3954_p1 }
  0x34   : > { %p368_p5 = scmp.lt.s32.totalorder %s3373_s17, 1  ;;  %v3267_v0 = vmov 0.0   ;;  %s3268_s25 = smov 127   ;;  %v3272_v13 = vmov 0   ;;  %vm3273_vm0 = vmmov 0   ;;  %vm410_vm1 = vcmask 1039360  }
  0x35   : > { %3243 = vsyncadd (%p3955_p0), [#allocation5], 4294965376  ;;  %2875 = vmatprep.subr.bf16.mxu1 %v3267_v0  ;;  %s3269_s26 = smov 126   ;;  %s3270_s29 = smov 125   ;;  %600 = vmatprep.mubr.bf16.mxu0 %v3272_v13  ;;  %vm444_vm2 = vcmask 1031168   ;;  %vm478_vm3 = vcmask 1022976  }
  0x36   : > { %s369_s28 = scalar_select %p368_p5, %s3373_s17, 1  ;;  %2885 = vmatprep.mubr.msk.bf16.mxu1 %vm3273_vm0, %v3267_v0  ;;  %3126 = vset.pattern.permute.xlu0 %v3272_v13  ;;  %vm512_vm4 = vcmask 1014784   ;;  %v3128_v41 = vld [vmem:[#allocation4] sm:$0xff]   ;;  %vm558_vm5 = vcmask 654336   ;;  %vm730_vm6 = vcmask 883712   ;;  %v3129_v49 = vld [vmem:[#allocation4 + $0x8] sm:$0xff]  }
  0x37   : > { %s3271_s30 = smov 124   ;;  %3127 = vset.pattern.permute.xlu1 %v3272_v13  ;;  %s3274_s12 = smov 108   ;;  %vm765_vm7 = vcmask 875520   ;;  %v3130_v57 = vld [vmem:[#allocation4 + $0x10] sm:$0xff]   ;;  %vm799_vm8 = vcmask 867328   ;;  %vm833_vm9 = vcmask 859136  }
  0x38   : > { %s2830_s11 = sshll.u32 %s369_s28, 6  ;;  %s3275_s18 = smov 107   ;;  %vm867_vm10 = vcmask 850944   ;;  %vm1121_vm11 = vcmask 719872   ;;  %vm1155_vm12 = vcmask 711680   ;;  %vm1189_vm13 = vcmask 703488  }
  0x39   : > { %s3441_s27 = scalar_lea.vmem %s3935_s0, %s2830_s11  ;;  %s3276_s28 = smov 106   ;;  %vm1223_vm14 = vcmask 695296   ;;  %vm1257_vm15 = vcmask 687104  }
  0x3a   : > { %v387_v1 = vld [vmem:[%s3441_s27 + $0x8] sm:$0xff]  ;;  %v386_v3 = vld [vmem:[%s3441_s27] sm:$0xff]  ;;  %v388_v6 = vld [vmem:[%s3441_s27 + $0x10] sm:$0xff]  ;;  %s3277_s11 = smov 105   ;;  %s3278_s20 = smov 104  }
  0x3b   : > { %v391_v2 = vld [vmem:[%s3441_s27 + $0x28] sm:$0xff]  ;;  %v390_v5 = vld [vmem:[%s3441_s27 + $0x20] sm:$0xff]  ;;  %v392_v7 = vld [vmem:[%s3441_s27 + $0x30] sm:$0xff]  ;;  %s3279_s21 = smov 88   ;;  %p3956_p9 = scmp.ne.s32.totalorder %s3949_s23, 0 }
  0x3c   : > { %v3446_v4 = vpack.c.bf16 %v391_v2, %v387_v1  ;;  %v3451_v8 = vpack.c.bf16 %v390_v5, %v386_v3  ;;  %v3453_v9 = vpack.c.bf16 %v392_v7, %v388_v6  ;;  %v389_v10 = vld [vmem:[%s3441_s27 + $0x18] sm:$0xff] }
  0x3d   : > { %v393_v11 = vld [vmem:[%s3441_s27 + $0x38] sm:$0xff] }
  0x3e   : > { %404 = vrot.lane.b32.xlu0 %v3446_v4, %s3268_s25  ;;  %568 = vmatprep.subr.bf16.mxu0 %v3446_v4  ;;  %v3460_v12 = vpack.c.bf16 %v393_v11, %v389_v10 }
  0x3f   : > { %402 = vrot.lane.b32.xlu1 %v3451_v8, %s3268_s25  ;;  %2876 = vmatpush3.bf16.msra.mxu1 %v3453_v9 }
  0x40   : > { %569 = vmatpush1.bf16.msra.mxu0 %v3451_v8  ;;  %2877 = vmatprep.subr.bf16.mxu1 %v3267_v0 }
  0x42   : > { %406 = vrot.lane.b32.xlu0 %v3453_v9, %s3268_s25 }
  0x43   : > { %408 = vrot.lane.b32.xlu1 %v3460_v12, %s3268_s25  ;;  %s3280_s25 = smov 87  }
  0x46   : > { %438 = vrot.lane.b32.xlu0 %v3446_v4, %s3269_s26 }
  0x47   : > { %440 = vrot.lane.b32.xlu1 %v3453_v9, %s3269_s26 }
  0x4a   : > { %436 = vrot.lane.b32.xlu0 %v3451_v8, %s3269_s26 }
  0x4b   : > { %442 = vrot.lane.b32.xlu1 %v3460_v12, %s3269_s26  ;;  %s3281_s26 = smov 86  }
  0x4e   : > { %472 = vrot.lane.b32.xlu0 %v3446_v4, %s3270_s29 }
  0x4f   : > { %474 = vrot.lane.b32.xlu1 %v3453_v9, %s3270_s29 }
  0x52   : > { %470 = vrot.lane.b32.xlu0 %v3451_v8, %s3270_s29 }
  0x53   : > { %476 = vrot.lane.b32.xlu1 %v3460_v12, %s3270_s29  ;;  %s3282_s29 = smov 85  }
  0x56   : > { %506 = vrot.lane.b32.xlu0 %v3446_v4, %s3271_s30 }
  0x57   : > { %508 = vrot.lane.b32.xlu1 %v3453_v9, %s3271_s30 }
  0x5a   : > { %504 = vrot.lane.b32.xlu0 %v3451_v8, %s3271_s30 }
  0x5b   : > { %510 = vrot.lane.b32.xlu1 %v3460_v12, %s3271_s30  ;;  %s3283_s30 = smov 84  }
  0x5e   : > { %724 = vrot.lane.b32.xlu0 %v3446_v4, %s3274_s12 }
  0x5f   : > { %726 = vrot.lane.b32.xlu1 %v3453_v9, %s3274_s12 }
  0x62   : > { %722 = vrot.lane.b32.xlu0 %v3451_v8, %s3274_s12 }
  0x63   : > { %728 = vrot.lane.b32.xlu1 %v3460_v12, %s3274_s12  ;;  %s3284_s12 = smov 68  }
  0x66   : > { %759 = vrot.lane.b32.xlu0 %v3446_v4, %s3275_s18 }
  0x67   : > { %761 = vrot.lane.b32.xlu1 %v3453_v9, %s3275_s18 }
  0x6a   : > { %757 = vrot.lane.b32.xlu0 %v3451_v8, %s3275_s18 }
  0x6b   : > { %763 = vrot.lane.b32.xlu1 %v3460_v12, %s3275_s18  ;;  %s3285_s18 = smov 67  }
  0x6e   : > { %793 = vrot.lane.b32.xlu0 %v3446_v4, %s3276_s28 }
  0x6f   : > { %795 = vrot.lane.b32.xlu1 %v3453_v9, %s3276_s28 }
  0x72   : > { %791 = vrot.lane.b32.xlu0 %v3451_v8, %s3276_s28 }
  0x73   : > { %797 = vrot.lane.b32.xlu1 %v3460_v12, %s3276_s28  ;;  %s3286_s28 = smov 66  }
  0x76   : > { %827 = vrot.lane.b32.xlu0 %v3446_v4, %s3277_s11 }
  0x77   : > { %829 = vrot.lane.b32.xlu1 %v3453_v9, %s3277_s11 }
  0x7a   : > { %825 = vrot.lane.b32.xlu0 %v3451_v8, %s3277_s11 }
  0x7b   : > { %831 = vrot.lane.b32.xlu1 %v3460_v12, %s3277_s11  ;;  %s3287_s11 = smov 65  }
  0x7e   : > { %861 = vrot.lane.b32.xlu0 %v3446_v4, %s3278_s20 }
  0x7f   : > { %863 = vrot.lane.b32.xlu1 %v3453_v9, %s3278_s20 }
  0x82   : > { %859 = vrot.lane.b32.xlu0 %v3451_v8, %s3278_s20 }
  0x83   : > { %865 = vrot.lane.b32.xlu1 %v3460_v12, %s3278_s20  ;;  %s3288_s20 = smov 64  }
  0x86   : > { %1115 = vrot.lane.b32.xlu0 %v3446_v4, %s3279_s21 }
  0x87   : > { %1117 = vrot.lane.b32.xlu1 %v3453_v9, %s3279_s21 }
  0x8a   : > { %1113 = vrot.lane.b32.xlu0 %v3451_v8, %s3279_s21 }
  0x8b   : > { %1119 = vrot.lane.b32.xlu1 %v3460_v12, %s3279_s21  ;;  %s3289_s21 = smov 48  }
  0x8e   : > { %1149 = vrot.lane.b32.xlu0 %v3446_v4, %s3280_s25 }
  0x8f   : > { %1151 = vrot.lane.b32.xlu1 %v3453_v9, %s3280_s25 }
  0x92   : > { %1147 = vrot.lane.b32.xlu0 %v3451_v8, %s3280_s25 }
  0x93   : > { %1153 = vrot.lane.b32.xlu1 %v3460_v12, %s3280_s25  ;;  %s3290_s25 = smov 47  }
  0x96   : > { %1183 = vrot.lane.b32.xlu0 %v3446_v4, %s3281_s26 }
  0x97   : > { %1185 = vrot.lane.b32.xlu1 %v3453_v9, %s3281_s26 }
  0x9a   : > { %1181 = vrot.lane.b32.xlu0 %v3451_v8, %s3281_s26 }
  0x9b   : > { %1187 = vrot.lane.b32.xlu1 %v3460_v12, %s3281_s26  ;;  %s3291_s26 = smov 46  }
  0x9e   : > { %1217 = vrot.lane.b32.xlu0 %v3446_v4, %s3282_s29 }
  0x9f   : > { %1219 = vrot.lane.b32.xlu1 %v3453_v9, %s3282_s29 }
  0xa2   : > { %1215 = vrot.lane.b32.xlu0 %v3451_v8, %s3282_s29 }
  0xa3   : > { %1221 = vrot.lane.b32.xlu1 %v3460_v12, %s3282_s29  ;;  %s3292_s29 = smov 45  }
  0xa6   : > { %1251 = vrot.lane.b32.xlu0 %v3446_v4, %s3283_s30 }
  0xa7   : > { %1253 = vrot.lane.b32.xlu1 %v3453_v9, %s3283_s30 }
  0xaa   : > { %1249 = vrot.lane.b32.xlu0 %v3451_v8, %s3283_s30 }
  0xab   : > { %1255 = vrot.lane.b32.xlu1 %v3460_v12, %s3283_s30  ;;  %s3293_s30 = smov 44  }
  0xae   : > { %1505 = vrot.lane.b32.xlu0 %v3446_v4, %s3284_s12 }
  0xaf   : > { %1507 = vrot.lane.b32.xlu1 %v3453_v9, %s3284_s12 }
  0xb0   : > { %v405_v14 = vpop.permute.xlu0 %404 }
  0xb1   : > { %v403_v15 = vpop.permute.xlu1 %402 }
  0xb2   : > { %1503 = vrot.lane.b32.xlu0 %v3451_v8, %s3284_s12  ;;  %v411_v20 = vsel %vm410_vm1, %v403_v15, %v405_v14  ;;  %v2014_v15 = vld [vmem:[%s3441_s27 + $0x8] sm:$0xff] }
  0xb3   : > { %1509 = vrot.lane.b32.xlu1 %v3460_v12, %s3284_s12 }
  0xb4   : > { %v407_v16 = vpop.permute.xlu0 %406 }
  0xb5   : > { %v409_v17 = vpop.permute.xlu1 %408  ;;  %v412_v18 = vsel %vm410_vm1, %v405_v14, %v407_v16 }
  0xb6   : > { %1539 = vrot.lane.b32.xlu0 %v3446_v4, %s3285_s18  ;;  %570 = vmatprep.subr.bf16.mxu0 %v412_v18  ;;  %v413_v19 = vsel %vm410_vm1, %v407_v16, %v409_v17  ;;  %v2018_v16 = vld [vmem:[%s3441_s27 + $0x28] sm:$0xff]  ;;  %v2015_v18 = vld [vmem:[%s3441_s27 + $0x10] sm:$0xff]  ;;  %vm1511_vm1 = vcmask 556032  }
  0xb7   : > { %1541 = vrot.lane.b32.xlu1 %v3453_v9, %s3285_s18  ;;  %2878 = vmatpush3.bf16.msra.mxu1 %v413_v19  ;;  %v2019_v19 = vld [vmem:[%s3441_s27 + $0x30] sm:$0xff] }
  0xb8   : > { %571 = vmatpush1.bf16.msra.mxu0 %v411_v20  ;;  %v439_v21 = vpop.permute.xlu0 %438  ;;  %2879 = vmatprep.subr.bf16.mxu1 %v3267_v0 }
  0xb9   : > { %v441_v22 = vpop.permute.xlu1 %440 }
  0xba   : > { %1537 = vrot.lane.b32.xlu0 %v3451_v8, %s3285_s18  ;;  %v446_v23 = vsel %vm444_vm2, %v439_v21, %v441_v22 }
  0xbb   : > { %1543 = vrot.lane.b32.xlu1 %v3460_v12, %s3285_s18  ;;  %572 = vmatprep.subr.bf16.mxu0 %v446_v23  ;;  %v2017_v23 = vld [vmem:[%s3441_s27 + $0x20] sm:$0xff] }
  0xbc   : > { %v437_v24 = vpop.permute.xlu0 %436 }
  0xbd   : > { %v443_v25 = vpop.permute.xlu1 %442  ;;  %v445_v26 = vsel %vm444_vm2, %v437_v24, %v439_v21  ;;  %v2022_v21 = vpack.c.bf16 %v2018_v16, %v2014_v15  ;;  %v3134_v16 = vld [vmem:[#allocation4 + $0x30] sm:$0xff]  }
  0xbe   : > { %1573 = vrot.lane.b32.xlu0 %v3446_v4, %s3286_s28  ;;  %573 = vmatpush1.bf16.msra.mxu0 %v445_v26  ;;  %v447_v27 = vsel %vm444_vm2, %v441_v22, %v443_v25  ;;  %v2013_v22 = vld [vmem:[%s3441_s27] sm:$0xff]  ;;  %v2016_v25 = vld [vmem:[%s3441_s27 + $0x18] sm:$0xff]  ;;  %vm1545_vm2 = vcmask 547840  }
  0xbf   : > { %1575 = vrot.lane.b32.xlu1 %v3453_v9, %s3286_s28  ;;  %2880 = vmatpush3.bf16.msra.mxu1 %v447_v27  ;;  %v2020_v26 = vld [vmem:[%s3441_s27 + $0x38] sm:$0xff] }
  0xc0   : > { %v473_v28 = vpop.permute.xlu0 %472  ;;  %2881 = vmatprep.subr.bf16.mxu1 %v3267_v0 }
  0xc1   : > { %v475_v29 = vpop.permute.xlu1 %474 }
  0xc2   : > { %1571 = vrot.lane.b32.xlu0 %v3451_v8, %s3286_s28  ;;  %v480_v30 = vsel %vm478_vm3, %v473_v28, %v475_v29 }
  0xc3   : > { %1577 = vrot.lane.b32.xlu1 %v3460_v12, %s3286_s28  ;;  %574 = vmatprep.subr.bf16.mxu0 %v480_v30 }
  0xc4   : > { %v471_v31 = vpop.permute.xlu0 %470 }
  0xc5   : > { %v477_v32 = vpop.permute.xlu1 %476  ;;  %v479_v33 = vsel %vm478_vm3, %v471_v31, %v473_v28 }
  0xc6   : > { %1607 = vrot.lane.b32.xlu0 %v3446_v4, %s3287_s11  ;;  %575 = vmatpush1.bf16.msra.mxu0 %v479_v33  ;;  %v481_v34 = vsel %vm478_vm3, %v475_v29, %v477_v32  ;;  %v3131_v29 = vld [vmem:[#allocation4 + $0x18] sm:$0xff]   ;;  %vm1579_vm3 = vcmask 539648  }
  0xc7   : > { %1609 = vrot.lane.b32.xlu1 %v3453_v9, %s3287_s11  ;;  %2882 = vmatpush3.bf16.msra.mxu1 %v481_v34 }
  0xc8   : > { %v507_v35 = vpop.permute.xlu0 %506  ;;  %2883 = vmatprep.subr.bf16.mxu1 %v3267_v0 }
  0xc9   : > { %v509_v36 = vpop.permute.xlu1 %508 }
  0xca   : > { %1605 = vrot.lane.b32.xlu0 %v3451_v8, %s3287_s11  ;;  %v514_v37 = vsel %vm512_vm4, %v507_v35, %v509_v36 }
  0xcb   : > { %1611 = vrot.lane.b32.xlu1 %v3460_v12, %s3287_s11  ;;  %576 = vmatprep.subr.bf16.mxu0 %v514_v37 }
  0xcc   : > { %v505_v38 = vpop.permute.xlu0 %504 }
  0xcd   : > { %v511_v39 = vpop.permute.xlu1 %510  ;;  %v513_v40 = vsel %vm512_vm4, %v505_v38, %v507_v35  ;;  %v3132_v38 = vld [vmem:[#allocation4 + $0x20] sm:$0xff]  }
  0xce   : > { %1641 = vrot.lane.b32.xlu0 %v3446_v4, %s3288_s20  ;;  %577 = vmatpush1.bf16.msra.mxu0 %v513_v40  ;;  %v515_v42 = vsel %vm512_vm4, %v509_v36, %v511_v39  ;;  %vm1613_vm4 = vcmask 531456  }
  0xcf   : > { %1643 = vrot.lane.b32.xlu1 %v3453_v9, %s3288_s20  ;;  %2884 = vmatpush3.bf16.msra.mxu1 %v515_v42  ;;  %v2285_v42 = vld [vmem:[%s3937_s2] sm:$0xff] }
  0xd0   : > { %v725_v43 = vpop.permute.xlu0 %724  ;;  %2897 = vmatprep.subr.bf16.mxu1 %v3267_v0 }
  0xd1   : > { %v727_v44 = vpop.permute.xlu1 %726  ;;  %2776 = vmatmul.mubr.msk.bf16.vlgmr.msra.gmra.mrb[0].mxu0 %vm558_vm5, %v3128_v41 }
  0xd2   : > { %1639 = vrot.lane.b32.xlu0 %v3451_v8, %s3288_s20  ;;  %v732_v45 = vsel %vm730_vm6, %v725_v43, %v727_v44  ;;  %2886 = vmatmul.mubr.msk.bf16.vlgmr.msra.gmra.mrb[0].mxu1 %vm558_vm5, %v3128_v41 }
  0xd3   : > { %1645 = vrot.lane.b32.xlu1 %v3460_v12, %s3288_s20  ;;  %923 = vmatprep.subr.bf16.mxu0 %v732_v45 }
  0xd4   : > { %v723_v46 = vpop.permute.xlu0 %722  ;;  %610 = vmatprep.mubr.bf16.mxu0 %v3272_v13  ;;  %2889 = vmatprep.mubr.msk.bf16.mxu1 %vm3273_vm0, %v3267_v0 }
  0xd5   : > { %v731_v47 = vsel %vm730_vm6, %v723_v46, %v725_v43  ;;  %v729_v48 = vpop.permute.xlu1 %728  ;;  %v2286_v43 = vld [vmem:[%s3937_s2 + $0x8] sm:$0xff] }
  0xd6   : > { %v733_v50 = vsel %vm730_vm6, %v727_v44, %v729_v48  ;;  %1895 = vrot.lane.b32.xlu0 %v3446_v4, %s3289_s21  ;;  %924 = vmatpush1.bf16.msra.mxu0 %v731_v47  ;;  %v2287_v47 = vld [vmem:[%s3937_s2 + $0x10] sm:$0xff]  ;;  %vm1647_vm6 = vcmask 523264  }
  0xd7   : > { %1897 = vrot.lane.b32.xlu1 %v3453_v9, %s3289_s21  ;;  %2898 = vmatpush3.bf16.msra.mxu1 %v733_v50  ;;  %v2288_v50 = vld [vmem:[%s3937_s2 + $0x18] sm:$0xff] }
  0xd8   : > { %v760_v51 = vpop.permute.xlu0 %759  ;;  %2899 = vmatprep.subr.bf16.mxu1 %v3267_v0 }
  0xd9   : > { %v762_v52 = vpop.permute.xlu1 %761  ;;  %2777 = vmatmul.mubr.msk.bf16.gmra.mrb[4].mxu0 %vm558_vm5, %v3129_v49 }
  0xda   : > { %1893 = vrot.lane.b32.xlu0 %v3451_v8, %s3289_s21  ;;  %v767_v53 = vsel %vm765_vm7, %v760_v51, %v762_v52  ;;  %2890 = vmatmul.mubr.msk.bf16.gmra.mrb[4].mxu1 %vm558_vm5, %v3129_v49  ;;  %v3133_v49 = vld [vmem:[#allocation4 + $0x28] sm:$0xff]  }
  0xdb   : > { %1899 = vrot.lane.b32.xlu1 %v3460_v12, %s3289_s21  ;;  %925 = vmatprep.subr.bf16.mxu0 %v767_v53  ;;  %v2289_v53 = vld [vmem:[%s3937_s2 + $0x20] sm:$0xff]  ;;  %s3294_s21 = smov [#allocation7]  }
  0xdc   : > { %v758_v54 = vpop.permute.xlu0 %757  ;;  %620 = vmatprep.mubr.bf16.mxu0 %v3272_v13  ;;  %2893 = vmatprep.mubr.msk.bf16.mxu1 %vm3273_vm0, %v3267_v0 }
  0xdd   : > { %v766_v55 = vsel %vm765_vm7, %v758_v54, %v760_v51  ;;  %v764_v56 = vpop.permute.xlu1 %763 }
  0xde   : > { %v768_v58 = vsel %vm765_vm7, %v762_v52, %v764_v56  ;;  %1929 = vrot.lane.b32.xlu0 %v3446_v4, %s3290_s25  ;;  %926 = vmatpush1.bf16.msra.mxu0 %v766_v55  ;;  %v2290_v55 = vld [vmem:[%s3937_s2 + $0x28] sm:$0xff]  ;;  %vm1901_vm7 = vcmask 392192  }
  0xdf   : > { %1931 = vrot.lane.b32.xlu1 %v3453_v9, %s3290_s25  ;;  %2900 = vmatpush3.bf16.msra.mxu1 %v768_v58 }
  0xe0   : > { %v794_v59 = vpop.permute.xlu0 %793  ;;  %2901 = vmatprep.subr.bf16.mxu1 %v3267_v0 }
  0xe1   : > { %v796_v60 = vpop.permute.xlu1 %795  ;;  %2778 = vmatmul.mubr.msk.bf16.gmra.mrb[8].mxu0 %vm558_vm5, %v3130_v57 }
  0xe2   : > { %1927 = vrot.lane.b32.xlu0 %v3451_v8, %s3290_s25  ;;  %v801_v61 = vsel %vm799_vm8, %v794_v59, %v796_v60  ;;  %2894 = vmatmul.mubr.msk.bf16.gmra.mrb[8].mxu1 %vm558_vm5, %v3130_v57 }
  0xe3   : > { %1933 = vrot.lane.b32.xlu1 %v3460_v12, %s3290_s25  ;;  %927 = vmatprep.subr.bf16.mxu0 %v801_v61  ;;  %s3200_s25 = sshll.u32 %s3294_s21, 4  ;;  %s3201_s25 = int_to_ptr.vmem [resolvable:$false] %s3200_s25 }
  0xe4   : > { %v792_v62 = vpop.permute.xlu0 %791  ;;  %955 = vmatprep.mubr.bf16.mxu0 %v3272_v13  ;;  %2907 = vmatprep.mubr.msk.bf16.mxu1 %vm3273_vm0, %v3267_v0 }
  0xe5   : > { %v800_v63 = vsel %vm799_vm8, %v792_v62, %v794_v59  ;;  %v798_v1 = vpop.permute.xlu1 %797 }
  0xe6   : > { %v802_v2 = vsel %vm799_vm8, %v796_v60, %v798_v1  ;;  %1963 = vrot.lane.b32.xlu0 %v3446_v4, %s3291_s26  ;;  %928 = vmatpush1.bf16.msra.mxu0 %v800_v63  ;;  %vm1935_vm8 = vcmask 384000  }
  0xe7   : > { %1965 = vrot.lane.b32.xlu1 %v3453_v9, %s3291_s26  ;;  %2902 = vmatpush3.bf16.msra.mxu1 %v802_v2 }
  0xe8   : > { %v828_v3 = vpop.permute.xlu0 %827  ;;  %2903 = vmatprep.subr.bf16.mxu1 %v3267_v0 }
  0xe9   : > { %v830_v5 = vpop.permute.xlu1 %829 }
  0xea   : > { %1961 = vrot.lane.b32.xlu0 %v3451_v8, %s3291_s26  ;;  %v835_v6 = vsel %vm833_vm9, %v828_v3, %v830_v5 }
  0xeb   : > { %1967 = vrot.lane.b32.xlu1 %v3460_v12, %s3291_s26  ;;  %929 = vmatprep.subr.bf16.mxu0 %v835_v6  ;;  %s365_s26 = sand.u32 1, %s3254_s14  }
  0xec   : > { %v826_v7 = vpop.permute.xlu0 %825  ;;  %s3894_s11 = scalar_lea.sflag [#allocation6], %s365_s26 }
  0xed   : > { %v834_v10 = vsel %vm833_vm9, %v826_v7, %v828_v3  ;;  %v832_v11 = vpop.permute.xlu1 %831 }
  0xee   : > { %v836_v14 = vsel %vm833_vm9, %v830_v5, %v832_v11  ;;  %1997 = vrot.lane.b32.xlu0 %v3446_v4, %s3292_s29  ;;  %930 = vmatpush1.bf16.msra.mxu0 %v834_v10  ;;  %vm1969_vm9 = vcmask 375808  }
  0xef   : > { %1999 = vrot.lane.b32.xlu1 %v3453_v9, %s3292_s29  ;;  %2904 = vmatpush3.bf16.msra.mxu1 %v836_v14  ;;  %v2023_v9 = vpack.c.bf16 %v2019_v19, %v2015_v18 }
  0xf0   : > { %v862_v17 = vpop.permute.xlu0 %861  ;;  %2905 = vmatprep.subr.bf16.mxu1 %v3267_v0 }
  0xf1   : > { %v864_v20 = vpop.permute.xlu1 %863 }
  0xf2   : > { %1995 = vrot.lane.b32.xlu0 %v3451_v8, %s3292_s29  ;;  %v869_v4 = vsel %vm867_vm10, %v862_v17, %v864_v20  ;;  %v2021_v8 = vpack.c.bf16 %v2017_v23, %v2013_v22  ;;  %v3135_v22 = vld [vmem:[#allocation4 + $0x38] sm:$0xff]  }
  0xf3   : > { %2001 = vrot.lane.b32.xlu1 %v3460_v12, %s3292_s29  ;;  %931 = vmatprep.subr.bf16.mxu0 %v869_v4  ;;  %v2024_v12 = vpack.c.bf16 %v2020_v26, %v2016_v25  ;;  %s3043_s29 = smul.u32 48, %s365_s26 }
  0xf4   : > { %v860_v24 = vpop.permute.xlu0 %859 }
  0xf5   : > { %v868_v27 = vsel %vm867_vm10, %v860_v24, %v862_v17  ;;  %v866_v28 = vpop.permute.xlu1 %865  ;;  %s367_s27 = scalar_lea.vmem [#allocation7], %s3043_s29  ;;  %s3202_s29 = scalar_lea.vmem %s3201_s25, 1536 }
  0xf6   : > { %v870_v30 = vsel %vm867_vm10, %v864_v20, %v866_v28  ;;  %2031 = vrot.lane.b32.xlu0 %v2022_v21, %s3293_s30  ;;  %932 = vmatpush1.bf16.msra.mxu0 %v868_v27  ;;  %vm2003_vm10 = vcmask 367616   ;;  %s2691_s12 = sshll.u32 %s367_s27, 4  ;;  %s3885_s12 = int_to_ptr.vmem [resolvable:$true] %s2691_s12 }
  0xf7   : > { %2033 = vrot.lane.b32.xlu1 %v2023_v9, %s3293_s30  ;;  %2906 = vmatpush3.bf16.msra.mxu1 %v870_v30  ;;  %v3136_v30 = vld [vmem:[#allocation4 + $0x40] sm:$0xff]   ;;  %s3196_s20 = scalar_lea.vmem %s3885_s12, 768  ;;  %p3203_p2 = scmp.lt.s32.totalorder %s3885_s12, %s3201_s25 }
  0xf8   : > { %v1116_v31 = vpop.permute.xlu0 %1115  ;;  %2919 = vmatprep.subr.bf16.mxu1 %v3267_v0  ;;  %p3197_p6 = scmp.ne.s32.totalorder %s3885_s12, %s3196_s20  ;;  %p3204_p3 = scmp.lt.s32.totalorder %s3202_s29, %s3196_s20 }
  0xf9   : > { %v1118_v32 = vpop.permute.xlu1 %1117  ;;  %2785 = vmatmul.mubr.msk.bf16.vlgmr.msra.gmra.mrb[0].mxu0 %vm558_vm5, %v3131_v29 }
  0xfa   : > { %2029 = vrot.lane.b32.xlu0 %v2021_v8, %s3293_s30  ;;  %v1123_v33 = vsel %vm1121_vm11, %v1116_v31, %v1118_v32  ;;  %2908 = vmatmul.mubr.msk.bf16.vlgmr.msra.gmra.mrb[12].mxu1 %vm558_vm5, %v3131_v29  ;;  %p3198_p10 = pnand %p3197_p6, %p3956_p9  ;;  %p3205_p4 = por %p3204_p3, %p3203_p2 }
  0xfb   : > { %2035 = vrot.lane.b32.xlu1 %v2024_v12, %s3293_s30  ;;  %1313 = vmatprep.subr.bf16.mxu0 %v1123_v33  ;;  %s3044_s30 = smul.u32 768, %s3373_s17 }
  0xfc   : > { %v1114_v34 = vpop.permute.xlu0 %1113  ;;  %2911 = vmatprep.mubr.msk.bf16.mxu1 %vm3273_vm0, %v3267_v0  ;;  %965 = vmatprep.mubr.bf16.mxu0 %v3272_v13  ;;  %p3199_p12 = pneg %p3198_p10 }
  0xfd   : > { %v1122_v35 = vsel %vm1121_vm11, %v1114_v34, %v1116_v31  ;;  %v1120_v36 = vpop.permute.xlu1 %1119  ;;  %s3890_s28 = scalar_lea.hbm %s3945_s10, %s3044_s30 }
  0xfe   : > { %v1124_v37 = vsel %vm1121_vm11, %v1118_v32, %v1120_v36  ;;  %1314 = vmatpush1.bf16.msra.mxu0 %v1122_v35  ;;  %2293 = vperm.xlu0 %3126, %v2285_v42   ;;  %vm2037_vm11 = vcmask 359424   ;;  %p3206_p7 = pnand %p3205_p4, %p3199_p12 }
  0xff   : > { %2920 = vmatpush3.bf16.msra.mxu1 %v1124_v37  ;;  %2298 = vperm.xlu1 %3127, %v2286_v43  }
 0x100   : > { %v1150_v39 = vpop.permute.xlu0 %1149  ;;  %2921 = vmatprep.subr.bf16.mxu1 %v3267_v0 }
 0x101   : > { %v1152_v40 = vpop.permute.xlu1 %1151  ;;  %2786 = vmatmul.mubr.msk.bf16.gmra.mrb[4].mxu0 %vm558_vm5, %v3132_v38 }
 0x102   : > { %v1157_v41 = vsel %vm1155_vm12, %v1150_v39, %v1152_v40  ;;  %2912 = vmatmul.mubr.msk.bf16.gmra.mrb[16].mxu1 %vm558_vm5, %v3132_v38  ;;  %975 = vmatprep.mubr.bf16.mxu0 %v3272_v13 }
 0x103   : > { %1315 = vmatprep.subr.bf16.mxu0 %v1157_v41  ;;  %2915 = vmatprep.mubr.msk.bf16.mxu1 %vm3273_vm0, %v3267_v0 }
 0x104   : > { %v1148_v44 = vpop.permute.xlu0 %1147  ;;  %2303 = vperm.xlu1 %3127, %v2287_v47   ;;  %2308 = vperm.xlu0 %3126, %v2288_v50   ;;  %v3137_v50 = vld [vmem:[#allocation4 + $0x48] sm:$0xff]  }
 0x105   : > { %v1156_v45 = vsel %vm1155_vm12, %v1148_v44, %v1150_v39  ;;  %v1154_v46 = vpop.permute.xlu1 %1153 }
 0x106   : > { %v1158_v48 = vsel %vm1155_vm12, %v1152_v40, %v1154_v46  ;;  %1316 = vmatpush1.bf16.msra.mxu0 %v1156_v45 }
 0x107   : > { %2922 = vmatpush3.bf16.msra.mxu1 %v1158_v48 }
 0x108   : > { %v1184_v51 = vpop.permute.xlu0 %1183  ;;  %2923 = vmatprep.subr.bf16.mxu1 %v3267_v0  ;;  %2313 = vperm.xlu1 %3127, %v2289_v53  }
 0x109   : > { %v1186_v52 = vpop.permute.xlu1 %1185  ;;  %2787 = vmatmul.mubr.msk.bf16.gmra.mrb[8].mxu0 %vm558_vm5, %v3133_v49  ;;  %2318 = vperm.xlu0 %3126, %v2290_v55  }
 0x10a   : > { %v1191_v54 = vsel %vm1189_vm13, %v1184_v51, %v1186_v52  ;;  %2916 = vmatmul.mubr.msk.bf16.gmra.mrb[20].mxu1 %vm558_vm5, %v3133_v49  ;;  %1345 = vmatprep.mubr.bf16.mxu0 %v3272_v13 }
 0x10b   : > { %1317 = vmatprep.subr.bf16.mxu0 %v1191_v54  ;;  %2929 = vmatprep.mubr.msk.bf16.mxu1 %vm3273_vm0, %v3267_v0 }
 0x10c   : > { %v1182_v56 = vpop.permute.xlu0 %1181 }
 0x10d   : > { %v1190_v57 = vsel %vm1189_vm13, %v1182_v56, %v1184_v51  ;;  %v1188_v58 = vpop.permute.xlu1 %1187 }
 0x10e   : > { %v1192_v59 = vsel %vm1189_vm13, %v1186_v52, %v1188_v58  ;;  %1318 = vmatpush1.bf16.msra.mxu0 %v1190_v57  ;;  %v3138_v58 = vld [vmem:[#allocation4 + $0x50] sm:$0xff]  }
 0x10f   : > { %2924 = vmatpush3.bf16.msra.mxu1 %v1192_v59 }
 0x110   : > { %v1218_v60 = vpop.permute.xlu0 %1217  ;;  %2925 = vmatprep.subr.bf16.mxu1 %v3267_v0 }
 0x111   : > { %v1220_v61 = vpop.permute.xlu1 %1219 }
 0x112   : > { %v1225_v62 = vsel %vm1223_vm14, %v1218_v60, %v1220_v61 }
 0x113   : > { %1319 = vmatprep.subr.bf16.mxu0 %v1225_v62 }
 0x114   : > { %v1216_v63 = vpop.permute.xlu0 %1215 }
 0x115   : > { %v1224_v1 = vsel %vm1223_vm14, %v1216_v63, %v1218_v60  ;;  %v1222_v2 = vpop.permute.xlu1 %1221 }
 0x116   : > { %v1226_v3 = vsel %vm1223_vm14, %v1220_v61, %v1222_v2  ;;  %1320 = vmatpush1.bf16.msra.mxu0 %v1224_v1 }
 0x117   : > { %2926 = vmatpush3.bf16.msra.mxu1 %v1226_v3  ;;  %v3139_v3 = vld [vmem:[#allocation4 + $0x58] sm:$0xff]  }
 0x118   : > { %v1252_v5 = vpop.permute.xlu0 %1251  ;;  %2927 = vmatprep.subr.bf16.mxu1 %v3267_v0 }
 0x119   : > { %v1254_v6 = vpop.permute.xlu1 %1253 }
 0x11a   : > { %v1259_v7 = vsel %vm1257_vm15, %v1252_v5, %v1254_v6 }
 0x11b   : > { %1321 = vmatprep.subr.bf16.mxu0 %v1259_v7 }
 0x11c   : > { %v1250_v10 = vpop.permute.xlu0 %1249 }
 0x11d   : > { %v1258_v11 = vsel %vm1257_vm15, %v1250_v10, %v1252_v5  ;;  %v1256_v14 = vpop.permute.xlu1 %1255 }
 0x11e   : > { %v1260_v15 = vsel %vm1257_vm15, %v1254_v6, %v1256_v14  ;;  %1322 = vmatpush1.bf16.msra.mxu0 %v1258_v11 }
 0x11f   : > { %2928 = vmatpush3.bf16.msra.mxu1 %v1260_v15 }
 0x120   : > { %v1506_v17 = vpop.permute.xlu0 %1505  ;;  %2941 = vmatprep.subr.bf16.mxu1 %v3267_v0 }
 0x121   : > { %v1508_v18 = vpop.permute.xlu1 %1507  ;;  %2794 = vmatmul.mubr.msk.bf16.vlgmr.msra.gmra.mrb[0].mxu0 %vm558_vm5, %v3134_v16 }
 0x122   : > { %2930 = vmatmul.mubr.msk.bf16.vlgmr.msra.gmra.mrb[24].mxu1 %vm558_vm5, %v3134_v16  ;;  %v1513_v19 = vsel %vm1511_vm1, %v1506_v17, %v1508_v18  ;;  %1355 = vmatprep.mubr.bf16.mxu0 %v3272_v13 }
 0x123   : > { %1703 = vmatprep.subr.bf16.mxu0 %v1513_v19  ;;  %2933 = vmatprep.mubr.msk.bf16.mxu1 %vm3273_vm0, %v3267_v0 }
 0x124   : > { %v1504_v20 = vpop.permute.xlu0 %1503 }
 0x125   : > { %v1512_v4 = vsel %vm1511_vm1, %v1504_v20, %v1506_v17  ;;  %v1510_v21 = vpop.permute.xlu1 %1509 }
 0x126   : > { %v1514_v9 = vsel %vm1511_vm1, %v1508_v18, %v1510_v21  ;;  %1704 = vmatpush1.bf16.msra.mxu0 %v1512_v4 }
 0x127   : > { %2942 = vmatpush3.bf16.msra.mxu1 %v1514_v9 }
 0x128   : > { %v1540_v23 = vpop.permute.xlu0 %1539  ;;  %2943 = vmatprep.subr.bf16.mxu1 %v3267_v0 }
 0x129   : > { %v1542_v24 = vpop.permute.xlu1 %1541  ;;  %2795 = vmatmul.mubr.msk.bf16.gmra.mrb[4].mxu0 %vm558_vm5, %v3135_v22 }
 0x12a   : > { %2934 = vmatmul.mubr.msk.bf16.gmra.mrb[28].mxu1 %vm558_vm5, %v3135_v22  ;;  %v1547_v25 = vsel %vm1545_vm2, %v1540_v23, %v1542_v24  ;;  %1365 = vmatprep.mubr.bf16.mxu0 %v3272_v13 }
 0x12b   : > { %1705 = vmatprep.subr.bf16.mxu0 %v1547_v25  ;;  %2937 = vmatprep.mubr.msk.bf16.mxu1 %vm3273_vm0, %v3267_v0 }
 0x12c   : > { %v1538_v26 = vpop.permute.xlu0 %1537 }
 0x12d   : > { %v1546_v27 = vsel %vm1545_vm2, %v1538_v26, %v1540_v23  ;;  %v1544_v28 = vpop.permute.xlu1 %1543 }
 0x12e   : > { %v1548_v29 = vsel %vm1545_vm2, %v1542_v24, %v1544_v28  ;;  %1706 = vmatpush1.bf16.msra.mxu0 %v1546_v27  ;;  %v3140_v27 = vld [vmem:[#allocation4 + $0x60] sm:$0xff]  }
 0x12f   : > { %2944 = vmatpush3.bf16.msra.mxu1 %v1548_v29  ;;  %v3141_v29 = vld [vmem:[#allocation4 + $0x68] sm:$0xff]  }
 0x130   : > { %v1574_v8 = vpop.permute.xlu0 %1573  ;;  %2945 = vmatprep.subr.bf16.mxu1 %v3267_v0 }
 0x131   : > { %v1576_v12 = vpop.permute.xlu1 %1575  ;;  %2796 = vmatmul.mubr.msk.bf16.gmra.mrb[8].mxu0 %vm558_vm5, %v3136_v30 }
 0x132   : > { %2938 = vmatmul.mubr.msk.bf16.gmra.mrb[32].mxu1 %vm558_vm5, %v3136_v30  ;;  %v1581_v31 = vsel %vm1579_vm3, %v1574_v8, %v1576_v12  ;;  %1735 = vmatprep.mubr.bf16.mxu0 %v3272_v13  ;;  %v3142_v30 = vld [vmem:[#allocation4 + $0x70] sm:$0xff]  }
 0x133   : > { %1707 = vmatprep.subr.bf16.mxu0 %v1581_v31  ;;  %2951 = vmatprep.mubr.msk.bf16.mxu1 %vm3273_vm0, %v3267_v0 }
 0x134   : > { %v1572_v32 = vpop.permute.xlu0 %1571 }
 0x135   : > { %v1580_v33 = vsel %vm1579_vm3, %v1572_v32, %v1574_v8  ;;  %v1578_v34 = vpop.permute.xlu1 %1577 }
 0x136   : > { %v1582_v35 = vsel %vm1579_vm3, %v1576_v12, %v1578_v34  ;;  %1708 = vmatpush1.bf16.msra.mxu0 %v1580_v33 }
 0x137   : > { %2946 = vmatpush3.bf16.msra.mxu1 %v1582_v35 }
 0x138   : > { %v1608_v36 = vpop.permute.xlu0 %1607  ;;  %2947 = vmatprep.subr.bf16.mxu1 %v3267_v0 }
 0x139   : > { %v1610_v37 = vpop.permute.xlu1 %1609 }
 0x13a   : > { %v1615_v38 = vsel %vm1613_vm4, %v1608_v36, %v1610_v37 }
 0x13b   : > { %1709 = vmatprep.subr.bf16.mxu0 %v1615_v38 }
 0x13c   : > { %v1606_v39 = vpop.permute.xlu0 %1605 }
 0x13d   : > { %v1614_v40 = vsel %vm1613_vm4, %v1606_v39, %v1608_v36  ;;  %v1612_v41 = vpop.permute.xlu1 %1611 }
 0x13e   : > { %v1616_v42 = vsel %vm1613_vm4, %v1610_v37, %v1612_v41  ;;  %1710 = vmatpush1.bf16.msra.mxu0 %v1614_v40 }
 0x13f   : > { %2948 = vmatpush3.bf16.msra.mxu1 %v1616_v42 }
 0x140   : > { %v1642_v43 = vpop.permute.xlu0 %1641  ;;  %2949 = vmatprep.subr.bf16.mxu1 %v3267_v0 }
 0x141   : > { %v1644_v44 = vpop.permute.xlu1 %1643 }
 0x142   : > { %v1649_v45 = vsel %vm1647_vm6, %v1642_v43, %v1644_v44 }
 0x143   : > { %1711 = vmatprep.subr.bf16.mxu0 %v1649_v45 }
 0x144   : > { %v1640_v46 = vpop.permute.xlu0 %1639 }
 0x145   : > { %v1648_v47 = vsel %vm1647_vm6, %v1640_v46, %v1642_v43  ;;  %v1646_v48 = vpop.permute.xlu1 %1645 }
 0x146   : > { %v1650_v49 = vsel %vm1647_vm6, %v1644_v44, %v1646_v48  ;;  %1712 = vmatpush1.bf16.msra.mxu0 %v1648_v47 }
 0x147   : > { %2950 = vmatpush3.bf16.msra.mxu1 %v1650_v49 }
 0x148   : > { %v1896_v51 = vpop.permute.xlu0 %1895  ;;  %2963 = vmatprep.subr.bf16.mxu1 %v3267_v0 }
 0x149   : > { %v1898_v52 = vpop.permute.xlu1 %1897  ;;  %2803 = vmatmul.mubr.msk.bf16.vlgmr.msra.gmra.mrb[0].mxu0 %vm558_vm5, %v3137_v50 }
 0x14a   : > { %2952 = vmatmul.mubr.msk.bf16.vlgmr.msra.gmra.mrb[36].mxu1 %vm558_vm5, %v3137_v50  ;;  %v1903_v53 = vsel %vm1901_vm7, %v1896_v51, %v1898_v52  ;;  %1745 = vmatprep.mubr.bf16.mxu0 %v3272_v13 }
 0x14b   : > { %2093 = vmatprep.subr.bf16.mxu0 %v1903_v53  ;;  %2955 = vmatprep.mubr.msk.bf16.mxu1 %vm3273_vm0, %v3267_v0 }
 0x14c   : > { %v1894_v54 = vpop.permute.xlu0 %1893 }
 0x14d   : > { %v1902_v55 = vsel %vm1901_vm7, %v1894_v54, %v1896_v51  ;;  %v1900_v56 = vpop.permute.xlu1 %1899 }
 0x14e   : > { %v1904_v57 = vsel %vm1901_vm7, %v1898_v52, %v1900_v56  ;;  %2094 = vmatpush1.bf16.msra.mxu0 %v1902_v55 }
 0x14f   : > { %2964 = vmatpush3.bf16.msra.mxu1 %v1904_v57 }
 0x150   : > { %v1930_v59 = vpop.permute.xlu0 %1929  ;;  %2965 = vmatprep.subr.bf16.mxu1 %v3267_v0 }
 0x151   : > { %v1932_v60 = vpop.permute.xlu1 %1931  ;;  %2804 = vmatmul.mubr.msk.bf16.gmra.mrb[4].mxu0 %vm558_vm5, %v3138_v58 }
 0x152   : > { %2956 = vmatmul.mubr.msk.bf16.gmra.mrb[40].mxu1 %vm558_vm5, %v3138_v58  ;;  %v1937_v61 = vsel %vm1935_vm8, %v1930_v59, %v1932_v60  ;;  %1755 = vmatprep.mubr.bf16.mxu0 %v3272_v13 }
 0x153   : > { %2095 = vmatprep.subr.bf16.mxu0 %v1937_v61  ;;  %2959 = vmatprep.mubr.msk.bf16.mxu1 %vm3273_vm0, %v3267_v0 }
 0x154   : > { %v1928_v62 = vpop.permute.xlu0 %1927 }
 0x155   : > { %v1936_v63 = vsel %vm1935_vm8, %v1928_v62, %v1930_v59  ;;  %v1934_v1 = vpop.permute.xlu1 %1933 }
 0x156   : > { %v1938_v2 = vsel %vm1935_vm8, %v1932_v60, %v1934_v1  ;;  %2096 = vmatpush1.bf16.msra.mxu0 %v1936_v63 }
 0x157   : > { %2966 = vmatpush3.bf16.msra.mxu1 %v1938_v2 }
 0x158   : > { %v1964_v5 = vpop.permute.xlu0 %1963  ;;  %2967 = vmatprep.subr.bf16.mxu1 %v3267_v0 }
 0x159   : > { %v1966_v6 = vpop.permute.xlu1 %1965  ;;  %2805 = vmatmul.mubr.msk.bf16.gmra.mrb[8].mxu0 %vm558_vm5, %v3139_v3 }
 0x15a   : > { %2960 = vmatmul.mubr.msk.bf16.gmra.mrb[44].mxu1 %vm558_vm5, %v3139_v3  ;;  %v1971_v7 = vsel %vm1969_vm9, %v1964_v5, %v1966_v6  ;;  %2125 = vmatprep.mubr.bf16.mxu0 %v3272_v13 }
 0x15b   : > { %2097 = vmatprep.subr.bf16.mxu0 %v1971_v7  ;;  %2973 = vmatprep.mubr.msk.bf16.mxu1 %vm3273_vm0, %v3267_v0 }
 0x15c   : > { %v1962_v10 = vpop.permute.xlu0 %1961 }
 0x15d   : > { %v1970_v11 = vsel %vm1969_vm9, %v1962_v10, %v1964_v5  ;;  %v1968_v14 = vpop.permute.xlu1 %1967 }
 0x15e   : > { %v1972_v15 = vsel %vm1969_vm9, %v1966_v6, %v1968_v14  ;;  %2098 = vmatpush1.bf16.msra.mxu0 %v1970_v11 }
 0x15f   : > { %2968 = vmatpush3.bf16.msra.mxu1 %v1972_v15 }
 0x160   : > { %v1998_v16 = vpop.permute.xlu0 %1997  ;;  %2969 = vmatprep.subr.bf16.mxu1 %v3267_v0 }
 0x161   : > { %v2000_v17 = vpop.permute.xlu1 %1999 }
 0x162   : > { %v2005_v18 = vsel %vm2003_vm10, %v1998_v16, %v2000_v17 }
 0x163   : > { %2099 = vmatprep.subr.bf16.mxu0 %v2005_v18 }
 0x164   : > { %v1996_v19 = vpop.permute.xlu0 %1995 }
 0x165   : > { %v2004_v20 = vsel %vm2003_vm10, %v1996_v19, %v1998_v16  ;;  %v2002_v4 = vpop.permute.xlu1 %2001 }
 0x166   : > { %v2006_v21 = vsel %vm2003_vm10, %v2000_v17, %v2002_v4  ;;  %2100 = vmatpush1.bf16.msra.mxu0 %v2004_v20 }
 0x167   : > { %2970 = vmatpush3.bf16.msra.mxu1 %v2006_v21 }
 0x168   : > { %v2032_v9 = vpop.permute.xlu0 %2031  ;;  %2971 = vmatprep.subr.bf16.mxu1 %v3267_v0 }
 0x169   : > { %v2034_v22 = vpop.permute.xlu1 %2033 }
 0x16a   : > { %v2039_v23 = vsel %vm2037_vm11, %v2032_v9, %v2034_v22 }
 0x16b   : > { %2101 = vmatprep.subr.bf16.mxu0 %v2039_v23 }
 0x16c   : > { %v2030_v24 = vpop.permute.xlu0 %2029 }
 0x16d   : > { %v2038_v25 = vsel %vm2037_vm11, %v2030_v24, %v2032_v9  ;;  %v2036_v26 = vpop.permute.xlu1 %2035 }
 0x16e   : > { %v2040_v28 = vsel %vm2037_vm11, %v2034_v22, %v2036_v26  ;;  %2102 = vmatpush1.bf16.msra.mxu0 %v2038_v25 }
 0x16f   : > { %2972 = vmatpush3.bf16.msra.mxu1 %v2040_v28 }
 0x170   : > { %2985 = vmatprep.subr.bf16.mxu1 %v3267_v0 }
 0x171   : > { %2812 = vmatmul.mubr.msk.bf16.vlgmr.msra.gmra.mrb[0].mxu0 %vm558_vm5, %v3140_v27 }
 0x172   : > { %2974 = vmatmul.mubr.msk.bf16.vlgmr.msra.gmra.mrb[48].mxu1 %vm558_vm5, %v3140_v27  ;;  %2135 = vmatprep.mubr.bf16.mxu0 %v3272_v13 }
 0x173   : > { %2977 = vmatprep.mubr.msk.bf16.mxu1 %vm3273_vm0, %v3267_v0 }
 0x179   : > { %2813 = vmatmul.mubr.msk.bf16.gmra.mrb[4].mxu0 %vm558_vm5, %v3141_v29 }
 0x17a   : > { %2978 = vmatmul.mubr.msk.bf16.gmra.mrb[52].mxu1 %vm558_vm5, %v3141_v29  ;;  %2145 = vmatprep.mubr.bf16.mxu0 %v3272_v13 }
 0x17b   : > { %2981 = vmatprep.mubr.msk.bf16.mxu1 %vm3273_vm0, %v3267_v0 }
 0x181   : > { %2814 = vmatmul.mubr.msk.bf16.gmra.mrb[8].mxu0 %vm558_vm5, %v3142_v30 }
 0x182   : > { %2982 = vmatmul.mubr.msk.bf16.gmra.mrb[56].mxu1 %vm558_vm5, %v3142_v30  ;;  %2577 = vmatprep.mubr.bf16.mxu0 %v3272_v13 }
 0x183   : > { %2991 = vmatprep.mubr.msk.bf16.mxu1 %vm3273_vm0, %v3267_v0  ;;  %vm2410_vm0 = vcmask 23552  }
 0x1a5   : > { %v665_v8 = vpop.f32.mrb[0].mxu1 }
 0x1a6   : > { %v2887_v12 = vpop.f32.mrb[1].mxu1 }
 0x1a7   : > { %v668_v31 = vpop.f32.mrb[2].mxu1 }
 0x1a8   : > { %v2888_v32 = vpop.f32.mrb[3].mxu1 }
 0x1a9   : > { %v2341_v32 = vlaneseq }
 0x1ad   : > { %v673_v33 = vpop.f32.mrb[4].mxu1 }
 0x1ae   : > { %v2891_v34 = vpop.f32.mrb[5].mxu1 }
 0x1af   : > { %v676_v35 = vpop.f32.mrb[6].mxu1 }
 0x1b0   : > { %v2892_v36 = vpop.f32.mrb[7].mxu1 }
 0x1b5   : > { %v681_v37 = vpop.f32.mrb[8].mxu1 }
 0x1b6   : > { %v2895_v38 = vpop.f32.mrb[9].mxu1 }
 0x1b7   : > { %v684_v39 = vpop.f32.mrb[10].mxu1 }
 0x1b8   : > { %v2896_v40 = vpop.f32.mrb[11].mxu1 }
 0x1cd   : > { %v1020_v41 = vpop.f32.mrb[12].mxu1 }
 0x1ce   : > { %v1063_v42 = vadd.f32 %v1020_v41, %v665_v8  ;;  %v2909_v43 = vpop.f32.mrb[13].mxu1  ;;  %v2299_v41 = vpop.permute.xlu1 %2298 }
 0x1cf   : > { %v1023_v44 = vpop.f32.mrb[14].mxu1 }
 0x1d0   : > { %v1066_v13 = vadd.f32 %v1023_v44, %v668_v31  ;;  %v2910_v45 = vpop.f32.mrb[15].mxu1 }
 0x1d5   : > { %v1028_v46 = vpop.f32.mrb[16].mxu1 }
 0x1d6   : > { %v1069_v47 = vadd.f32 %v1028_v46, %v673_v33  ;;  %v2913_v48 = vpop.f32.mrb[17].mxu1  ;;  %v2342_v33 = vshrl.u32 %v2341_v32, 7 }
 0x1d7   : > { %v1031_v49 = vpop.f32.mrb[18].mxu1 }
 0x1d8   : > { %v1072_v50 = vadd.f32 %v1031_v49, %v676_v35  ;;  %v2914_v51 = vpop.f32.mrb[19].mxu1  ;;  %v2343_v34 = vsub.s32 0, %v2342_v33  ;;  %v2339_v35 = vld [vmem:[%s3944_s9] sm:$0x7]  ;;  %v2347_v36 = vsub.s32 1, %v2342_v33  ;;  %v2351_v38 = vsub.s32 2, %v2342_v33 }
 0x1da   : > { %v3716_v46 = vrot.slane %v2339_v35, %v2351_v38 }
 0x1dd   : > { %v1036_v52 = vpop.f32.mrb[20].mxu1 }
 0x1de   : > { %v1075_v53 = vadd.f32 %v1036_v52, %v681_v37  ;;  %v2917_v54 = vpop.f32.mrb[21].mxu1  ;;  %v2294_v37 = vpop.permute.xlu0 %2293 }
 0x1df   : > { %v1039_v55 = vpop.f32.mrb[22].mxu1 }
 0x1e0   : > { %v1078_v56 = vadd.f32 %v1039_v55, %v684_v39  ;;  %v2918_v57 = vpop.f32.mrb[23].mxu1  ;;  %v3710_v39 = vrot.slane %v2339_v35, %v2343_v34 }
 0x1f5   : > { %v1410_v58 = vpop.f32.mrb[24].mxu1 }
 0x1f6   : > { %v1453_v59 = vadd.f32 %v1410_v58, %v1063_v42  ;;  %v2931_v60 = vpop.f32.mrb[25].mxu1  ;;  %v3712_v42 = vrot.slane %v2339_v35, %v2347_v36 }
 0x1f7   : > { %v1413_v61 = vpop.f32.mrb[26].mxu1 }
 0x1f8   : > { %v1456_v62 = vadd.f32 %v1413_v61, %v1066_v13  ;;  %v2932_v63 = vpop.f32.mrb[27].mxu1 }
 0x1fd   : > { %v1418_v1 = vpop.f32.mrb[28].mxu1 }
 0x1fe   : > { %v1459_v2 = vadd.f32 %v1418_v1, %v1069_v47  ;;  %v2935_v3 = vpop.f32.mrb[29].mxu1  ;;  %v2304_v1 = vpop.permute.xlu1 %2303 }
 0x1ff   : > { %v1421_v5 = vpop.f32.mrb[30].mxu1 }
 0x200   : > { %v1462_v6 = vadd.f32 %v1421_v5, %v1072_v50  ;;  %v2936_v7 = vpop.f32.mrb[31].mxu1  ;;  %v2309_v5 = vpop.permute.xlu0 %2308 }
 0x202   : > { %v2314_v33 = vpop.permute.xlu1 %2313 }
 0x204   : > { %v2319_v34 = vpop.permute.xlu0 %2318 }
 0x205   : > { %v1426_v10 = vpop.f32.mrb[32].mxu1 }
 0x206   : > { %v1465_v11 = vadd.f32 %v1426_v10, %v1075_v53  ;;  %v2939_v14 = vpop.f32.mrb[33].mxu1 }
 0x207   : > { %v1429_v15 = vpop.f32.mrb[34].mxu1 }
 0x208   : > { %v1468_v16 = vadd.f32 %v1429_v15, %v1078_v56  ;;  %v2940_v17 = vpop.f32.mrb[35].mxu1 }
 0x21d   : > { %v1800_v18 = vpop.f32.mrb[36].mxu1 }
 0x21e   : > { %v1843_v19 = vadd.f32 %v1800_v18, %v1453_v59  ;;  %v2953_v20 = vpop.f32.mrb[37].mxu1 }
 0x21f   : > { %v1803_v4 = vpop.f32.mrb[38].mxu1 }
 0x220   : > { %v1846_v21 = vadd.f32 %v1803_v4, %v1456_v62  ;;  %v2954_v9 = vpop.f32.mrb[39].mxu1 }
 0x225   : > { %v1808_v22 = vpop.f32.mrb[40].mxu1 }
 0x226   : > { %v1849_v23 = vadd.f32 %v1808_v22, %v1459_v2  ;;  %v2957_v24 = vpop.f32.mrb[41].mxu1 }
 0x227   : > { %v1811_v25 = vpop.f32.mrb[42].mxu1 }
 0x228   : > { %v1852_v26 = vadd.f32 %v1811_v25, %v1462_v6  ;;  %v2958_v27 = vpop.f32.mrb[43].mxu1 }
 0x22d   : > { %v1816_v28 = vpop.f32.mrb[44].mxu1 }
 0x22e   : > { %v3703_v29 = vadd.f32 %v1816_v28, %v1465_v11  ;;  %v2961_v30 = vpop.f32.mrb[45].mxu1 }
 0x22f   : > { %v1819_v8 = vpop.f32.mrb[46].mxu1 }
 0x230   : > { %v3705_v12 = vadd.f32 %v1819_v8, %v1468_v16  ;;  %v2962_v31 = vpop.f32.mrb[47].mxu1 }
 0x244   : > { %v2127_v40 = vpop.f32.mrb[0].mxu0 }
 0x245   : > { %v3714_v43 = vadd.f32 %v2294_v37, %v2127_v40  ;;  %v2190_v44 = vpop.f32.mrb[48].mxu1  ;;  %v2129_v13 = vpop.f32.mrb[1].mxu0 }
 0x246   : > { %v2233_v45 = vadd.f32 %v2190_v44, %v1843_v19  ;;  %v3718_v47 = vadd.f32 %v2294_v37, %v2129_v13  ;;  %v2975_v48 = vpop.f32.mrb[49].mxu1  ;;  %v2131_v49 = vpop.f32.mrb[2].mxu0 }
 0x247   : > { %v2356_v50 = vmul.f32 %v3710_v39, %v3714_v43  ;;  %v3722_v51 = vadd.f32 %v2299_v41, %v2131_v49  ;;  %v2193_v52 = vpop.f32.mrb[50].mxu1  ;;  %v2133_v53 = vpop.f32.mrb[3].mxu0 }
 0x248   : > { %v3724_v54 = vadd.f32 %v2294_v37, %v2233_v45  ;;  %v2357_v55 = vmul.f32 %v3712_v42, %v3718_v47  ;;  %v2236_v56 = vadd.f32 %v2193_v52, %v1846_v21  ;;  %v3728_v57 = vadd.f32 %v2299_v41, %v2133_v53  ;;  %v2976_v58 = vpop.f32.mrb[51].mxu1 }
 0x249   : > { %v2359_v59 = vmul.f32 %v3710_v39, %v3722_v51 }
 0x24a   : > { %v2358_v60 = vmul.f32 %v3716_v46, %v3724_v54  ;;  %v2374_v61 = vadd.f32 %v2357_v55, %v2356_v50  ;;  %v3734_v62 = vadd.f32 %v2299_v41, %v2236_v56  ;;  %v2360_v63 = vmul.f32 %v3712_v42, %v3728_v57 }
 0x24c   : > { %v2361_v2 = vmul.f32 %v3716_v46, %v3734_v62  ;;  %v2378_v3 = vadd.f32 %v2360_v63, %v2359_v59  ;;  %v2137_v6 = vpop.f32.mrb[4].mxu0  ;;  %v2375_v7 = vadd.f32 %v2374_v61, %v2358_v60 }
 0x24d   : > { %v3740_v10 = vadd.f32 %v2304_v1, %v2137_v6  ;;  %v2198_v11 = vpop.f32.mrb[52].mxu1  ;;  %v2139_v14 = vpop.f32.mrb[5].mxu0 }
 0x24e   : > { %v2239_v15 = vadd.f32 %v2198_v11, %v1849_v23  ;;  %v3742_v16 = vadd.f32 %v2304_v1, %v2139_v14  ;;  %v2979_v17 = vpop.f32.mrb[53].mxu1  ;;  %2376 = vadd.xlane.f32.xlu1 %v2375_v7  ;;  %v2141_v18 = vpop.f32.mrb[6].mxu0  ;;  %v2379_v19 = vadd.f32 %v2378_v3, %v2361_v2  ;;  %v2398_v14 = vld [vmem:[%s3938_s3] sm:$0xff] }
 0x24f   : > { %v2362_v20 = vmul.f32 %v3710_v39, %v3740_v10  ;;  %v2201_v4 = vpop.f32.mrb[54].mxu1  ;;  %v3746_v21 = vadd.f32 %v2309_v5, %v2141_v18  ;;  %v2143_v9 = vpop.f32.mrb[7].mxu0 }
 0x250   : > { %v3748_v22 = vadd.f32 %v2304_v1, %v2239_v15  ;;  %v2363_v24 = vmul.f32 %v3712_v42, %v3742_v16  ;;  %v2242_v25 = vadd.f32 %v2201_v4, %v1852_v26  ;;  %v3752_v23 = vadd.f32 %v2309_v5, %v2143_v9  ;;  %v2980_v27 = vpop.f32.mrb[55].mxu1  ;;  %2380 = vadd.xlane.f32.xlu0 %v2379_v19  ;;  %v2401_v19 = vld [vmem:[%s3938_s3 + $0x18] sm:$0xff] }
 0x251   : > { %v2365_v28 = vmul.f32 %v3710_v39, %v3746_v21 }
 0x252   : > { %v2364_v30 = vmul.f32 %v3716_v46, %v3748_v22  ;;  %v2382_v8 = vadd.f32 %v2363_v24, %v2362_v20  ;;  %v3758_v31 = vadd.f32 %v2309_v5, %v2242_v25  ;;  %v2366_v32 = vmul.f32 %v3712_v42, %v3752_v23 }
 0x254   : > { %v2367_v26 = vmul.f32 %v3716_v46, %v3758_v31  ;;  %v2386_v35 = vadd.f32 %v2366_v32, %v2365_v28  ;;  %v2147_v36 = vpop.f32.mrb[8].mxu0  ;;  %v2383_v37 = vadd.f32 %v2382_v8, %v2364_v30  ;;  %v2402_v8 = vld [vmem:[%s3938_s3 + $0x20] sm:$0xff] }
 0x255   : > { %v3764_v38 = vadd.f32 %v2314_v33, %v2147_v36  ;;  %v2206_v40 = vpop.f32.mrb[56].mxu1  ;;  %v2149_v41 = vpop.f32.mrb[9].mxu0 }
 0x256   : > { %v2245_v44 = vadd.f32 %v2206_v40, %v3703_v29  ;;  %v3767_v13 = vadd.f32 %v2314_v33, %v2149_v41  ;;  %v2983_v45 = vpop.f32.mrb[57].mxu1  ;;  %2384 = vadd.xlane.f32.xlu0 %v2383_v37  ;;  %v2151_v48 = vpop.f32.mrb[10].mxu0  ;;  %v2387_v49 = vadd.f32 %v2386_v35, %v2367_v26  ;;  %v2403_v26 = vld [vmem:[%s3938_s3 + $0x28] sm:$0xff] }
 0x257   : > { %v2368_v50 = vmul.f32 %v3710_v39, %v3764_v38  ;;  %v2209_v52 = vpop.f32.mrb[58].mxu1  ;;  %v3771_v53 = vadd.f32 %v2319_v34, %v2151_v48  ;;  %v2153_v55 = vpop.f32.mrb[11].mxu0 }
 0x258   : > { %v3773_v56 = vadd.f32 %v2314_v33, %v2245_v44  ;;  %v2369_v58 = vmul.f32 %v3712_v42, %v3767_v13  ;;  %v2248_v29 = vadd.f32 %v2209_v52, %v3705_v12  ;;  %v3778_v59 = vadd.f32 %v2319_v34, %v2153_v55  ;;  %v2984_v60 = vpop.f32.mrb[59].mxu1  ;;  %2388 = vadd.xlane.f32.xlu1 %v2387_v49 }
 0x259   : > { %v2371_v61 = vmul.f32 %v3710_v39, %v3771_v53  ;;  %v2399_v39 = vld [vmem:[%s3938_s3 + $0x8] sm:$0xff]  ;;  %v2429_v60 = vld [vmem:[%s3939_s4] sm:$0xff] }
 0x25a   : > { %v2370_v63 = vmul.f32 %v3716_v46, %v3773_v56  ;;  %v2390_v1 = vadd.f32 %v2369_v58, %v2368_v50  ;;  %v3784_v2 = vadd.f32 %v2319_v34, %v2248_v29  ;;  %v2372_v3 = vmul.f32 %v3712_v42, %v3778_v59  ;;  %v2400_v42 = vld [vmem:[%s3938_s3 + $0x10] sm:$0xff]  ;;  %v2430_v29 = vld [vmem:[%s3939_s4 + $0x8] sm:$0xff] }
 0x25c   : > { %v2373_v5 = vmul.f32 %v3716_v46, %v3784_v2  ;;  %v2394_v12 = vadd.f32 %v2372_v3, %v2371_v61  ;;  %v2391_v6 = vadd.f32 %v2390_v1, %v2370_v63  ;;  %v2432_v63 = vld [vmem:[%s3939_s4 + $0x18] sm:$0xff]  ;;  %v2431_v1 = vld [vmem:[%s3939_s4 + $0x10] sm:$0xff] }
 0x25e   : > { %2392 = vadd.xlane.f32.xlu0 %v2391_v6  ;;  %v2395_v7 = vadd.f32 %v2394_v12, %v2373_v5 }
 0x260   : > { %2396 = vadd.xlane.f32.xlu1 %v2395_v7 }
 0x2db   : > { %v2377_v15 = vpop.xlane.xlu1 %2376 }
 0x2dc   : > { %v2404_v46 = vmul.f32 %v2398_v14, %v2377_v15  ;;  %v2433_v14 = vld [vmem:[%s3939_s4 + $0x20] sm:$0xff] }
 0x2dd   : > { %v2381_v11 = vpop.xlane.xlu0 %2380 }
 0x2de   : > { %v2405_v17 = vmul.f32 %v2399_v39, %v2381_v11  ;;  %v2411_v24 = vsel %vm2410_vm0, %v2404_v46, 0.0  ;;  %v2434_v11 = vld [vmem:[%s3939_s4 + $0x28] sm:$0xff] }
 0x2e0   : > { %v2412_v20 = vsel %vm2410_vm0, %v2405_v17, 0.0 }
 0x2e1   : > { %v2413_v28 = vadd.f32 %v2412_v20, %v2411_v24  ;;  %v2525_v20 = vld [vmem:[%s3941_s6 + $0x8] sm:$0xff]  ;;  %v2647_v24 = vld [vmem:[%s3943_s8] sm:$0xff] }
 0x2e3   : > { %v2385_v18 = vpop.xlane.xlu0 %2384 }
 0x2e4   : > { %v2406_v4 = vmul.f32 %v2400_v42, %v2385_v18 }
 0x2e5   : > { %v2389_v9 = vpop.xlane.xlu1 %2388 }
 0x2e6   : > { %v2414_v25 = vsel %vm2410_vm0, %v2406_v4, 0.0  ;;  %v2407_v27 = vmul.f32 %v2401_v19, %v2389_v9  ;;  %v2629_v4 = vld [vmem:[%s3942_s7] sm:$0xff] }
 0x2e7   : > { %v2415_v30 = vadd.f32 %v2414_v25, %v2413_v28  ;;  %v2524_v9 = vld [vmem:[%s3941_s6] sm:$0xff]  ;;  %v2630_v25 = vld [vmem:[%s3942_s7 + $0x8] sm:$0xff] }
 0x2e8   : > { %v2416_v32 = vsel %vm2410_vm0, %v2407_v27, 0.0  ;;  %v2648_v27 = vld [vmem:[%s3943_s8 + $0x8] sm:$0xff] }
 0x2e9   : > { %v2417_v35 = vadd.f32 %v2416_v32, %v2415_v30 }
 0x2eb   : > { %v2393_v33 = vpop.xlane.xlu0 %2392 }
 0x2ec   : > { %v2408_v34 = vmul.f32 %v2402_v8, %v2393_v33 }
 0x2ed   : > { %v2397_v36 = vpop.xlane.xlu1 %2396 }
 0x2ee   : > { %v2418_v37 = vsel %vm2410_vm0, %v2408_v34, 0.0  ;;  %v2409_v40 = vmul.f32 %v2403_v26, %v2397_v36 }
 0x2ef   : > { %v2419_v41 = vadd.f32 %v2418_v37, %v2417_v35 }
 0x2f0   : > { %v2420_v44 = vsel %vm2410_vm0, %v2409_v40, 0.0 }
 0x2f1   : > { %v2421_v45 = vadd.f32 %v2420_v44, %v2419_v41 }
 0x2f3   : > { %v2422_v48 = vrot.slane %v2421_v45, 4 }
 0x2f5   : > { %v2423_v49 = vadd.f32 %v2422_v48, %v2421_v45 }
 0x2f7   : > { %v2424_v50 = vrot.slane %v2423_v49, 2 }
 0x2f9   : > { %v2425_v52 = vadd.f32 %v2424_v50, %v2423_v49 }
 0x2fb   : > { %v2426_v55 = vrot.slane %v2425_v52, 1 }
 0x2fd   : > { %v2427_v58 = vadd.f32 %v2426_v55, %v2425_v52 }
 0x2ff   : > { %v2428_v61 = vmax.f32 %v2427_v58, 0.0 }
 0x301   : > { %v2436_v3 = vmul.f32 %v2430_v29, %v2428_v61  ;;  %v2435_v5 = vmul.f32 %v2429_v60, %v2428_v61  ;;  %v2438_v7 = vmul.f32 %v2432_v63, %v2428_v61  ;;  %v2437_v39 = vmul.f32 %v2431_v1, %v2428_v61 }
 0x302   : > { %v2440_v42 = vmul.f32 %v2434_v11, %v2428_v61  ;;  %v2439_v46 = vmul.f32 %v2433_v14, %v2428_v61 }
 0x303   : > { %v2444_v12 = vsel %vm2410_vm0, %v2436_v3, 0.0  ;;  %v2441_v6 = vsel %vm2410_vm0, %v2435_v5, 0.0  ;;  %v2450_v15 = vsel %vm2410_vm0, %v2438_v7, 0.0  ;;  %v2447_v17 = vsel %vm2410_vm0, %v2437_v39, 0.0 }
 0x304   : > { %2445 = vadd.xlane.f32.xlu1 %v2444_v12  ;;  %2442 = vadd.xlane.f32.xlu0 %v2441_v6  ;;  %v2456_v18 = vsel %vm2410_vm0, %v2440_v42, 0.0  ;;  %v2453_v19 = vsel %vm2410_vm0, %v2439_v46, 0.0 }
 0x308   : > { %2451 = vadd.xlane.f32.xlu1 %v2450_v15  ;;  %2448 = vadd.xlane.f32.xlu0 %v2447_v17 }
 0x30c   : > { %2457 = vadd.xlane.f32.xlu1 %v2456_v18  ;;  %2454 = vadd.xlane.f32.xlu0 %v2453_v19 }
 0x31d   : > { %2533 = vperm.xlu1 %3127, %v2525_v20  }
 0x321   : > { %2633 = vperm.xlu1 %3127, %v2629_v4  }
 0x322   : > { %2528 = vperm.xlu0 %3126, %v2524_v9  }
 0x325   : > { %2651 = vperm.xlu1 %3127, %v2647_v24  }
 0x326   : > { %2638 = vperm.xlu0 %3126, %v2630_v25  }
 0x32a   : > { %2656 = vperm.xlu0 %3126, %v2648_v27  }
 0x391   : > { %v2446_v28 = vpop.xlane.xlu1 %2445  ;;  %v2443_v30 = vpop.xlane.xlu0 %2442 }
 0x392   : > { %v2819_v8 = vmul.f32 -1.442695, %v2446_v28  ;;  %v2818_v32 = vmul.f32 -1.442695, %v2443_v30 }
 0x394   : > { %3144 = vpow2.f32 %v2819_v8 }
 0x395   : > { %3146 = vpow2.f32 %v2818_v32  ;;  %v2452_v33 = vpop.xlane.xlu1 %2451  ;;  %v2449_v26 = vpop.xlane.xlu0 %2448 }
 0x396   : > { %v2821_v34 = vmul.f32 -1.442695, %v2452_v33  ;;  %v2820_v35 = vmul.f32 -1.442695, %v2449_v26 }
 0x398   : > { %3148 = vpow2.f32 %v2821_v34 }
 0x399   : > { %3150 = vpow2.f32 %v2820_v35  ;;  %v2458_v36 = vpop.xlane.xlu1 %2457  ;;  %v2455_v37 = vpop.xlane.xlu0 %2454 }
 0x39a   : > { %v2823_v40 = vmul.f32 -1.442695, %v2458_v36  ;;  %v2822_v41 = vmul.f32 -1.442695, %v2455_v37 }
 0x39c   : > { %3152 = vpow2.f32 %v2823_v40 }
 0x39d   : > { %3154 = vpow2.f32 %v2822_v41 }
 0x39e   : > { %v3145_v44 = vpop.eup %3144 }
 0x39f   : > { %v3147_v45 = vpop.eup %3146  ;;  %v2478_v48 = vadd.f32 1.0, %v3145_v44 }
 0x3a0   : > { %v2477_v49 = vadd.f32 1.0, %v3147_v45 }
 0x3a1   : > { %3156 = vrcp.f32 %v2478_v48 }
 0x3a2   : > { %v3149_v50 = vpop.eup %3148  ;;  %3158 = vrcp.f32 %v2477_v49 }
 0x3a3   : > { %v3151_v52 = vpop.eup %3150  ;;  %v2480_v55 = vadd.f32 1.0, %v3149_v50 }
 0x3a4   : > { %v2479_v58 = vadd.f32 1.0, %v3151_v52 }
 0x3a5   : > { %3160 = vrcp.f32 %v2480_v55 }
 0x3a6   : > { %v3153_v29 = vpop.eup %3152  ;;  %3162 = vrcp.f32 %v2479_v58 }
 0x3a7   : > { %v3155_v60 = vpop.eup %3154  ;;  %v2482_v61 = vadd.f32 1.0, %v3153_v29 }
 0x3a8   : > { %v2481_v63 = vadd.f32 1.0, %v3155_v60 }
 0x3a9   : > { %3164 = vrcp.f32 %v2482_v61 }
 0x3aa   : > { %3166 = vrcp.f32 %v2481_v63 }
 0x3ab   : > { %v3157_v1 = vpop.eup %3156 }
 0x3ac   : > { %v3159_v3 = vpop.eup %3158  ;;  %v2499_v5 = vmul.f32 %v3157_v1, %v3728_v57  ;;  %v2500_v12 = vmul.f32 %v3157_v1, %v3734_v62  ;;  %v2498_v6 = vmul.f32 %v3157_v1, %v3722_v51 }
 0x3ad   : > { %v2496_v7 = vmul.f32 %v3159_v3, %v3718_v47  ;;  %v2497_v39 = vmul.f32 %v3159_v3, %v3724_v54  ;;  %v2495_v11 = vmul.f32 %v3159_v3, %v3714_v43 }
 0x3af   : > { %v3161_v14 = vpop.eup %3160  ;;  %v2514_v15 = vpack.c.bf16 %v2499_v5, %v2496_v7  ;;  %v2515_v17 = vpack.c.bf16 %v2500_v12, %v2497_v39  ;;  %v2513_v42 = vpack.c.bf16 %v2498_v6, %v2495_v11 }
 0x3b0   : > { %v3163_v46 = vpop.eup %3162  ;;  %v2505_v18 = vmul.f32 %v3161_v14, %v3752_v23  ;;  %v2506_v19 = vmul.f32 %v3161_v14, %v3758_v31  ;;  %v2504_v57 = vmul.f32 %v3161_v14, %v3746_v21 }
 0x3b1   : > { %2545 = vmatprep.subr.bf16.mxu0 %v2514_v15  ;;  %2986 = vmatpush3.bf16.msra.mxu1 %v2515_v17  ;;  %v2502_v51 = vmul.f32 %v3163_v46, %v3742_v16  ;;  %v2503_v47 = vmul.f32 %v3163_v46, %v3748_v22  ;;  %v2501_v54 = vmul.f32 %v3163_v46, %v3740_v10 }
 0x3b2   : > { %2546 = vmatpush1.bf16.msra.mxu0 %v2513_v42  ;;  %2987 = vmatprep.subr.bf16.mxu1 %v3267_v0 }
 0x3b3   : > { %v3165_v43 = vpop.eup %3164  ;;  %v2517_v62 = vpack.c.bf16 %v2505_v18, %v2502_v51  ;;  %v2518_v20 = vpack.c.bf16 %v2506_v19, %v2503_v47  ;;  %v2516_v4 = vpack.c.bf16 %v2504_v57, %v2501_v54 }
 0x3b4   : > { %v3167_v23 = vpop.eup %3166  ;;  %v2511_v31 = vmul.f32 %v3165_v43, %v3778_v59  ;;  %v2512_v21 = vmul.f32 %v3165_v43, %v3784_v2  ;;  %v2510_v9 = vmul.f32 %v3165_v43, %v3771_v53  ;;  %v3143_v53 = vld [vmem:[%s3940_s5] sm:$0xff]  }
 0x3b5   : > { %2547 = vmatprep.subr.bf16.mxu0 %v2517_v62  ;;  %2988 = vmatpush3.bf16.msra.mxu1 %v2518_v20  ;;  %v2508_v16 = vmul.f32 %v3167_v23, %v3767_v13  ;;  %v2509_v10 = vmul.f32 %v3167_v23, %v3773_v56  ;;  %v2507_v22 = vmul.f32 %v3167_v23, %v3764_v38  ;;  %v2534_v13 = vpop.permute.xlu1 %2533  ;;  %v2529_v38 = vpop.permute.xlu0 %2528 }
 0x3b6   : > { %2548 = vmatpush1.bf16.msra.mxu0 %v2516_v4  ;;  %2989 = vmatprep.subr.bf16.mxu1 %v3267_v0 }
 0x3b7   : > { %v2520_v24 = vpack.c.bf16 %v2511_v31, %v2508_v16  ;;  %v2521_v25 = vpack.c.bf16 %v2512_v21, %v2509_v10  ;;  %v2519_v27 = vpack.c.bf16 %v2510_v9, %v2507_v22 }
 0x3b9   : > { %2549 = vmatprep.subr.bf16.mxu0 %v2520_v24  ;;  %2990 = vmatpush3.bf16.msra.mxu1 %v2521_v25  ;;  %v2634_v56 = vpop.permute.xlu1 %2633  ;;  %v2639_v0 = vpop.permute.xlu0 %2638 }
 0x3ba   : > { %2550 = vmatpush1.bf16.msra.mxu0 %v2519_v27 }
 0x3bc   : > { %2992 = vmatmul.mubr.msk.bf16.vlgmr.msra.gmra.mrb[60].mxu1 %vm1901_vm7, %v3143_v53 }
 0x3bd   : > { %2825 = vmatmul.mubr.msk.bf16.vlgmr.msra.gmra.mrb[12].mxu0 %vm1901_vm7, %v3143_v53  ;;  %v2652_v40 = vpop.permute.xlu1 %2651  ;;  %v2657_v55 = vpop.permute.xlu0 %2656 }
 0x48f   : > { %v2622_v59 = vpop.f32.mrb[60].mxu1 }
 0x490   : > { %v2623_v2 = vadd.f32 %v2622_v59, %v2529_v38  ;;  %v2579_v28 = vpop.f32.mrb[12].mxu0  ;;  %v2993_v30 = vpop.f32.mrb[61].mxu1 }
 0x491   : > { %v2580_v8 = vadd.f32 %v2579_v28, %v2529_v38  ;;  %v2581_v32 = vpop.f32.mrb[13].mxu0  ;;  %v2625_v33 = vpop.f32.mrb[62].mxu1 }
 0x492   : > { %v2643_v26 = vmul.f32 %v2634_v56, %v2623_v2  ;;  %v2582_v34 = vadd.f32 %v2581_v32, %v2529_v38  ;;  %v2626_v35 = vadd.f32 %v2625_v33, %v2534_v13  ;;  %v2583_v36 = vpop.f32.mrb[14].mxu0  ;;  %v2994_v37 = vpop.f32.mrb[63].mxu1 }
 0x493   : > { %v2641_v41 = vmul.f32 %v2634_v56, %v2580_v8  ;;  %v2584_v44 = vadd.f32 %v2583_v36, %v2534_v13  ;;  %v2585_v45 = vpop.f32.mrb[15].mxu0 }
 0x494   : > { %v2661_v48 = vadd.f32 %v2652_v40, %v2643_v26  ;;  %v2642_v49 = vmul.f32 %v2634_v56, %v2582_v34  ;;  %v2646_v50 = vmul.f32 %v2639_v0, %v2626_v35  ;;  %v2586_v52 = vadd.f32 %v2585_v45, %v2534_v13 }
 0x495   : > { %v2659_v58 = vadd.f32 %v2652_v40, %v2641_v41  ;;  %v2644_v29 = vmul.f32 %v2639_v0, %v2584_v44 }
 0x496   : > { %v2667_v60 = vmax.f32 %v2661_v48, 0.0  ;;  %v2660_v61 = vadd.f32 %v2652_v40, %v2642_v49  ;;  %v2664_v63 = vadd.f32 %v2657_v55, %v2646_v50  ;;  %v2645_v1 = vmul.f32 %v2639_v0, %v2586_v52 }
 0x497   : > { %v2665_v3 = vmax.f32 %v2659_v58, 0.0  ;;  %v2662_v5 = vadd.f32 %v2657_v55, %v2644_v29 }
 0x498   : > { %2673 = vst [vmem:[%s367_s27 + $0x10] sm:$0xff] %v2667_v60  ;;  %v2666_v12 = vmax.f32 %v2660_v61, 0.0  ;;  %v2670_v6 = vmax.f32 %v2664_v63, 0.0  ;;  %v2663_v7 = vadd.f32 %v2657_v55, %v2645_v1 }
 0x499   : > { %2671 = vst [vmem:[%s367_s27] sm:$0xff] %v2665_v3  ;;  %v2668_v39 = vmax.f32 %v2662_v5, 0.0 }
 0x49a   : > { %2672 = vst [vmem:[%s367_s27 + $0x8] sm:$0xff] %v2666_v12  ;;  %2676 = vst [vmem:[%s367_s27 + $0x28] sm:$0xff] %v2670_v6  ;;  %v2669_v11 = vmax.f32 %v2663_v7, 0.0 }
 0x49b   : > { %2674 = vst [vmem:[%s367_s27 + $0x18] sm:$0xff] %v2668_v39 }
 0x49c   : > { %2675 = vst [vmem:[%s367_s27 + $0x20] sm:$0xff] %v2669_v11 }
 0x49d   : > { %3209 = shalt.err (!%p3206_p7)
}
 0x49e   : > { %s3210_s26 = scalar_lea.hbm %s3890_s28, 768  ;;  %s3214_s17 = scalar_lea.hbm %s3945_s10, 1536 }
 0x49f   : > { %p3211_p8 = scmp.ne.s32.totalorder %s3890_s28, %s3210_s26  ;;  %p3215_p1 = scmp.lt.u32.totalorder %s3890_s28, %s3945_s10 }
 0x4a0   : > { %p3216_p0 = scmp.lt.u32.totalorder %s3214_s17, %s3210_s26  ;;  %p3218_p6 = scmp.lt.u32.totalorder %s3210_s26, %s3890_s28 }
 0x4a1   : > { %p3212_p11 = pnand %p3211_p8, %p3956_p9 }
 0x4a2   : > { %p3217_p5 = por %p3216_p0, %p3215_p1 }
 0x4a3   : > { %p3213_p13 = pneg %p3212_p11 }
 0x4a4   : > { %p3219_p10 = por %p3218_p6, %p3217_p5 }
 0x4a6   : > { %p3220_p12 = pnand %p3219_p10, %p3213_p13 }
 0x4a8   : > { %3223 = shalt.err (!%p3220_p12)
}
 0x4a9   : > { %s3295_s20 = smov 384   ;;  %s3296_s25 = smov 24  }
 0x4aa   : > { %3049 = dma.vmem_to_hbm [thread:$0]  (%p3956_p9), %s3885_s12, 768, %s3890_s28, %s3894_s11, %s3295_s20, %s3295_s20, %s3296_s25  }
 0x4ab PF: > { %p3061_p2 = scmp.ge.s32.totalorder %s3262_s16, 2  ;;  %s2706_s29 = sand.u32 1, %s3250_s13  }
 0x4ac   : > { %p3957_p3 = scmp.ne.s32.totalorder %s3950_s24, 0  ;;  %s2707_s26 = scalar_lea.sflag [#allocation6], %s2706_s29 }
 0x4ae   : > { %p3056_p4 = pnand %p3061_p2, %p3957_p3 }
 0x4b0   : > { %3245 = dma.done.wait (!%p3056_p4), %s2707_s26, 768  }
 0x4b1   : > { %3247 = vsyncadd (!%p3056_p4), %s2707_s26, 4294966528  ;;  %p21_p7 = scmp.ge.s32.totalorder %s3377_s19, 4   ;;  %s3958_s13 = smov %s3254_s14 }
 0x4b2   : > { %s3959_s14 = smov %s3258_s15  ;;  %s3960_s15 = smov %s3388_s22 }
 0x4b3   : > { %s3961_s16 = smov %s3377_s19  ;;  %23 = sbr.rel (!%p21_p7) target bundleno = 4 (0x4), region = 105 }
 0x4ba   :  { %2712 = vsyncpa [#allocation5], 1 }
 0x4bb   :  { %2714 = vsyncpa [#allocation5 + $0x1], 1 }
 0x4bc   :  { %2715 = vsyncpa [#allocation6], 1 }
 0x4bd   :  { %2717 = vsyncpa [#allocation6 + $0x1], 1 }

</bundles_post_ra>
